<compile_context>
chip_gen: v5e
topology: v5e:2x2
jax: 0.10.0
libtpu: 0.0.40
codegen_flags: <defaults>
</compile_context>

<pallas_src>
import jax
import jax.numpy as jnp
from jax.experimental import pallas as pl
from jax.experimental.pallas import tpu as pltpu


def _round_up(x, m):
    return ((x + m - 1) // m) * m


# ----------------------------------------------------------------------------
# Fused tap-accumulation conv kernel
# ----------------------------------------------------------------------------
def _make_tap_conv_kernel(taps, q_rows, ws_row, wo_valid, apply_relu,
                          pad_out, has_shortcut):
    """Per-sample kernel.  For q in [0, q_rows):
         acc[q] = bias + sum_t x[phase_t, q + off_t, :] @ W_t (+ xs[q] @ Wsc)
       then ReLU, border masking and (optionally spatially padded) store."""

    def kernel(*refs):
        if has_shortcut:
            x_ref, w_ref, xs_ref, ws_ref, b_ref, o_ref = refs
        else:
            x_ref, w_ref, b_ref, o_ref = refs
        npad = o_ref.shape[-1]

        # accumulator starts as the folded-BN bias -> no epilogue bias add
        acc = jnp.broadcast_to(b_ref[...], (q_rows, npad)).astype(jnp.float32)

        if has_shortcut:
            acc = acc + jnp.dot(xs_ref[0], ws_ref[...],
                                preferred_element_type=jnp.float32)

        # 9-tap accumulation: 3x3 conv as a sum of shifted 1x1 matmuls, all
        # operands resident in VMEM (weights fetched once for the whole grid).
        for t, (p, off) in enumerate(taps):
            a = x_ref[0, p, off:off + q_rows, :]            # (q_rows, Cin)
            acc = acc + jnp.dot(a, w_ref[t],
                                preferred_element_type=jnp.float32)

        if apply_relu:
            acc = jnp.maximum(acc, 0.0)

        if pad_out:
            # zero the columns that land on the next conv's zero-padding halo
            col = jax.lax.broadcasted_iota(jnp.int32, (q_rows, 1), 0) % ws_row
            acc = jnp.where(col < wo_valid, acc, 0.0)
            out = acc.astype(o_ref.dtype)
            o_ref[...] = jnp.zeros(o_ref.shape, o_ref.dtype)
            # constant flat shift: output row (h,w) -> padded (h+1, w+1)
            o_ref[0, ws_row + 1:ws_row + 1 + q_rows, :] = out
        else:
            o_ref[0] = acc.astype(o_ref.dtype)

    return kernel


def tap_conv(x_ph, w_taps, bias, *, taps, q_rows, ws_row, wo_valid,
             relu, pad_out, out_rows, shortcut=None, out_dtype=jnp.bfloat16):
    """Fused 3x3 conv (+ folded-BN bias, optional fused 1x1 shortcut, ReLU).

    x_ph:   (N, P, L, Cin) bf16  flattened (phase, padded spatial) input
    w_taps: (9, Cin, Np)   bf16  per-tap weights, BN scale folded, lane-padded
    bias:   (1, Np)        f32
    shortcut: optional (xs (N, q_rows, Cs) bf16, wsc (Cs, Np) bf16)
    returns (N, out_rows, Np) in out_dtype
    """
    N, P, L, cin = x_ph.shape
    nine, cin_w, Np = w_taps.shape
    assert nine == 9 and cin_w == cin and Np % 128 == 0
    assert bias.shape == (1, Np)

    in_specs = [
        pl.BlockSpec((1, P, L, cin), lambda n: (n, 0, 0, 0)),
        pl.BlockSpec((9, cin, Np), lambda n: (0, 0, 0)),   # resident weights
    ]
    args = [x_ph, w_taps]
    cs = 0
    if shortcut is not None:
        xs, wsc = shortcut
        cs = xs.shape[-1]
        assert xs.shape == (N, q_rows, cs) and wsc.shape == (cs, Np)
        in_specs += [pl.BlockSpec((1, q_rows, cs), lambda n: (n, 0, 0)),
                     pl.BlockSpec((cs, Np), lambda n: (0, 0))]
        args += [xs, wsc]
    in_specs.append(pl.BlockSpec((1, Np), lambda n: (0, 0)))
    args.append(bias)

    kernel = _make_tap_conv_kernel(taps, q_rows, ws_row, wo_valid,
                                   relu, pad_out, shortcut is not None)

    flops = 2 * N * q_rows * Np * (9 * cin + cs)
    bytes_accessed = (x_ph.size * x_ph.dtype.itemsize
                      + w_taps.size * 2 + bias.size * 4
                      + N * out_rows * Np * jnp.dtype(out_dtype).itemsize)
    if shortcut is not None:
        bytes_accessed += args[2].size * 2 + args[3].size * 2

    return pl.pallas_call(
        kernel,
        out_shape=jax.ShapeDtypeStruct((N, out_rows, Np), out_dtype),
        grid=(N,),
        in_specs=in_specs,
        out_specs=pl.BlockSpec((1, out_rows, Np), lambda n: (n, 0, 0)),
        compiler_params=pltpu.CompilerParams(
            dimension_semantics=("parallel",),
            vmem_limit_bytes=32 * 1024 * 1024),
        cost_estimate=pl.CostEstimate(flops=int(flops), transcendentals=0,
                                      bytes_accessed=int(bytes_accessed)),
    )(*args)


# ----------------------------------------------------------------------------
# JAX glue: phase split, taps, parameter packing
# ----------------------------------------------------------------------------
def make_taps(stride, ws_row):
    """Tap t = 3*di + dj -> (phase index, constant flat offset)."""
    taps = []
    for di in range(3):
        for dj in range(3):
            p = (di % stride) * stride + (dj % stride)
            off = (di // stride) * ws_row + (dj // stride)
            taps.append((p, off))
    return taps


def conv_input_phases(x_nhwc, stride, Ho, Wo):
    """Zero-pad (pad=1), split into stride^2 phase images, pad each to
    (Ho+3, Wo+2) and flatten spatially -> (N, s*s, (Ho+3)*(Wo+2), C)."""
    N, H, W, C = x_nhwc.shape
    s = stride
    hs, ws = Ho + 3, Wo + 2
    xp = jnp.pad(x_nhwc, ((0, 0), (1, 1), (1, 1), (0, 0)))
    phases = []
    for pi in range(s):
        for pj in range(s):
            ph = xp[:, pi::s, pj::s, :]
            ph = jnp.pad(ph, ((0, 0), (0, hs - ph.shape[1]),
                              (0, ws - ph.shape[2]), (0, 0)))
            phases.append(ph)
    xph = jnp.stack(phases, axis=1)
    return xph.reshape(N, s * s, hs * ws, C)


def fold_bn(gamma, beta, mean, var, eps=1e-5):
    scale = gamma / jnp.sqrt(var + eps)
    return scale, beta - mean * scale


def init_resblock_params(key, inchannel, outchannel, stride, lane=128):
    """Inference-mode params mirroring the PyTorch module.  BN scale folded
    into bf16 weight columns; Cout zero-padded to a lane-dense multiple of
    128.  Also returns the raw f32 params for a pure-JAX reference."""
    Np = _round_up(outchannel, lane)
    ks = jax.random.split(key, 16)

    def bn_raw(k0, k1, k2, k3, c):
        gamma = 0.5 + jax.random.uniform(k0, (c,), jnp.float32)
        beta = 0.1 * jax.random.normal(k1, (c,), jnp.float32)
        mean = 0.1 * jax.random.normal(k2, (c,), jnp.float32)
        var = 0.5 + jax.random.uniform(k3, (c,), jnp.float32)
        return gamma, beta, mean, var

    def pack_taps(w_oihw, scale, cin_pad=None):
        Co, Ci, KH, KW = w_oihw.shape
        w = jnp.transpose(w_oihw, (2, 3, 1, 0))          # (KH, KW, Cin, Cout)
        if cin_pad is not None and cin_pad > Ci:
            w = jnp.pad(w, ((0, 0), (0, 0), (0, cin_pad - Ci), (0, 0)))
        w = w * scale[None, None, None, :]                # fold BN scale
        w = jnp.pad(w, ((0, 0), (0, 0), (0, 0), (0, Np - Co)))
        return w.reshape(KH * KW, w.shape[2], Np).astype(jnp.bfloat16)

    def pad_bias(b):
        return jnp.pad(b, (0, Np - outchannel)).reshape(1, Np).astype(jnp.float32)

    has_proj = (stride != 1) or (inchannel != outchannel)
    p = {"cout": outchannel, "cout_padded": Np, "has_projection": has_proj}
    raw = {}

    w1 = 0.1 * jax.random.normal(ks[0], (outchannel, inchannel, 3, 3), jnp.float32)
    bn1 = bn_raw(ks[1], ks[2], ks[3], ks[4], outchannel)
    s1, b1 = fold_bn(*bn1)
    p["w1"], p["b1"] = pack_taps(w1, s1), pad_bias(b1)
    raw["w1"], raw["bn1"] = w1, bn1

    # conv2 contracts over the lane-padded Np input channels; padded rows of
    # w2 and padded channels of y1 are exactly zero.
    w2 = 0.1 * jax.random.normal(ks[5], (outchannel, outchannel, 3, 3), jnp.float32)
    bn2 = bn_raw(ks[6], ks[7], ks[8], ks[9], outchannel)
    s2, b2 = fold_bn(*bn2)
    p["w2"] = pack_taps(w2, s2, cin_pad=Np)
    raw["w2"], raw["bn2"] = w2, bn2

    if has_proj:
        wsc = 0.1 * jax.random.normal(ks[10], (outchannel, inchannel, 1, 1),
                                      jnp.float32)
        bnsc = bn_raw(ks[11], ks[12], ks[13], ks[14], outchannel)
        ssc, bsc = fold_bn(*bnsc)
        wsc_mat = jnp.transpose(wsc[:, :, 0, 0], (1, 0)) * ssc[None, :]
        wsc_mat = jnp.pad(wsc_mat, ((0, 0), (0, Np - outchannel)))
        p["wsc"] = wsc_mat.astype(jnp.bfloat16)
        p["b2"] = pad_bias(b2 + bsc)           # fold both BN biases together
        raw["wsc"], raw["bnsc"] = wsc, bnsc
    else:
        # identity shortcut expressed as a matmul with the identity matrix so
        # the same fused conv2 kernel handles both cases.
        p["wsc"] = jnp.eye(outchannel, Np, dtype=jnp.bfloat16)
        p["b2"] = pad_bias(b2)
    return p, raw


# ----------------------------------------------------------------------------
# ResBlock forward
# ----------------------------------------------------------------------------
def resblock_forward(x_nchw, params, stride):
    """ResBlock forward. Input/output: NCHW float32 (PyTorch convention)."""
    x = jnp.transpose(x_nchw, (0, 2, 3, 1)).astype(jnp.bfloat16)  # NHWC bf16
    N, H, W, Cin = x.shape
    Cout, Np = params["cout"], params["cout_padded"]

    Ho = (H - 1) // stride + 1
    Wo = (W - 1) // stride + 1
    hs, ws = Ho + 3, Wo + 2
    q = Ho * ws                  # rows computed per sample by each conv
    l_pad = hs * ws              # conv1 output == conv2 input (flat, padded)

    # conv1: 3x3(stride) + BN + ReLU; emits conv2's zero-padded flat input.
    x_ph = conv_input_phases(x, stride, Ho, Wo)
    y1p = tap_conv(x_ph, params["w1"], params["b1"],
                   taps=make_taps(stride, ws), q_rows=q, ws_row=ws,
                   wo_valid=Wo, relu=True, pad_out=True, out_rows=l_pad,
                   out_dtype=jnp.bfloat16)

    # shortcut operand (fused into the conv2 kernel as an extra matmul)
    xs = x[:, ::stride, ::stride, :] if params["has_projection"] else x
    xs = jnp.pad(xs, ((0, 0), (0, 0), (0, ws - Wo), (0, 0)))
    xs = xs.reshape(N, q, xs.shape[-1])

    # conv2: 3x3(1) + BN, + shortcut, + final ReLU -- one fused kernel.
    y2 = tap_conv(y1p[:, None], params["w2"], params["b2"],
                  taps=make_taps(1, ws), q_rows=q, ws_row=ws, wo_valid=Wo,
                  relu=True, pad_out=False, out_rows=q,
                  shortcut=(xs, params["wsc"]), out_dtype=jnp.float32)

    out = y2.reshape(N, Ho, ws, Np)[:, :, :Wo, :Cout]
    return jnp.transpose(out, (0, 3, 1, 2))          # NCHW f32


# ----------------------------------------------------------------------------
# Pure-JAX f32 reference (inference-mode BN) for a correctness check
# ----------------------------------------------------------------------------
def _conv_nchw(x, w, stride, pad):
    return jax.lax.conv_general_dilated(
        x, w, window_strides=(stride, stride),
        padding=((pad, pad), (pad, pad)),
        dimension_numbers=("NCHW", "OIHW", "NCHW"))


def resblock_reference(x_nchw, raw, stride, has_projection):
    def bn(y, bnp):
        s, b = fold_bn(*bnp)
        return y * s[None, :, None, None] + b[None, :, None, None]

    y = jax.nn.relu(bn(_conv_nchw(x_nchw, raw["w1"], stride, 1), raw["bn1"]))
    y = bn(_conv_nchw(y, raw["w2"], 1, 1), raw["bn2"])
    if has_projection:
        sc = bn(_conv_nchw(x_nchw, raw["wsc"], stride, 0), raw["bnsc"])
    else:
        sc = x_nchw
    return jax.nn.relu(y + sc)


if __name__ == "__main__":
    key = jax.random.PRNGKey(0)
    k_x, k_p = jax.random.split(key)

    batch, inchannel, outchannel, spatial, stride = 2, 4, 8, 16, 2
    x = jax.random.normal(k_x, (batch, inchannel, spatial, spatial),
                          jnp.float32)
    params, raw = init_resblock_params(k_p, inchannel, outchannel, stride)

    out = jax.block_until_ready(resblock_forward(x, params, stride))
    ref = jax.block_until_ready(
        resblock_reference(x, raw, stride, params["has_projection"]))

    assert out.shape == (batch, outchannel, spatial // stride, spatial // stride)
    assert out.dtype == jnp.float32
    assert bool(jnp.all(jnp.isfinite(out)))
    assert bool(jnp.all(out >= 0.0))          # final ReLU
    err = float(jnp.max(jnp.abs(out - ref)))  # bf16 policy vs f32 reference
    assert err < 0.15, f"max abs err {err}"
    print("KERNEL_OK")
</pallas_src>

<mosaic_0001>
module attributes {stable_mosaic.version = 11 : i64} {
  func.func @kernel(%arg0: i32, %arg1: memref<1x4x110x4xbf16, #tpu.memory_space<vmem>>, %arg2: memref<9x4x128xbf16, #tpu.memory_space<vmem>>, %arg3: memref<1x128xf32, #tpu.memory_space<vmem>>, %arg4: memref<1x110x128xbf16, #tpu.memory_space<vmem>>) attributes {dimension_semantics = [#tpu.dimension_semantics<parallel>], iteration_bounds = array<i64: 2>, scalar_prefetch = 0 : i64, scratch_operands = 0 : i64, tpu.core_type = #tpu.core_type<tc>, window_params = [{transform_indices = @transform_0, window_bounds = array<i64: 1, 4, 110, 4>}, {pipeline_mode = #tpu.pipeline_mode<synchronous>, transform_indices = @transform_1, window_bounds = array<i64: 9, 4, 128>}, {pipeline_mode = #tpu.pipeline_mode<synchronous>, transform_indices = @transform_2, window_bounds = array<i64: 1, 128>}, {transform_indices = @transform_3, window_bounds = array<i64: 1, 110, 128>}]} {
    %c0 = arith.constant 0 : index
    %c0_0 = arith.constant 0 : index
    %0 = vector.load %arg3[%c0, %c0_0] : memref<1x128xf32, #tpu.memory_space<vmem>>, vector<1x128xf32>
    %1 = vector.shape_cast %0 : vector<1x128xf32> to vector<1x128xf32>
    %2 = vector.broadcast %1 : vector<1x128xf32> to vector<80x128xf32>
    %c0_1 = arith.constant 0 : index
    %c0_2 = arith.constant 0 : index
    %c0_3 = arith.constant 0 : index
    %c0_4 = arith.constant 0 : index
    %3 = vector.load %arg1[%c0_1, %c0_2, %c0_3, %c0_4] : memref<1x4x110x4xbf16, #tpu.memory_space<vmem>>, vector<1x1x80x4xbf16>
    %4 = vector.shape_cast %3 : vector<1x1x80x4xbf16> to vector<80x4xbf16>
    %c0_5 = arith.constant 0 : index
    %c0_6 = arith.constant 0 : index
    %c0_7 = arith.constant 0 : index
    %5 = vector.load %arg2[%c0_5, %c0_6, %c0_7] : memref<9x4x128xbf16, #tpu.memory_space<vmem>>, vector<1x4x128xbf16>
    %6 = vector.shape_cast %5 : vector<1x4x128xbf16> to vector<4x128xbf16>
    %cst = arith.constant dense<0.000000e+00> : vector<80x128xf32>
    %7 = tpu.matmul %4, %6, %cst {dimension_numbers = #tpu.dot_dimension_numbers<[1], [0], [0], [1], [0, 0, 1, 1], [], []>} : vector<80x4xbf16>, vector<4x128xbf16>, vector<80x128xf32> -> vector<80x128xf32>
    %8 = arith.addf %2, %7 : vector<80x128xf32>
    %c0_8 = arith.constant 0 : index
    %c1 = arith.constant 1 : index
    %c0_9 = arith.constant 0 : index
    %c0_10 = arith.constant 0 : index
    %9 = vector.load %arg1[%c0_8, %c1, %c0_9, %c0_10] : memref<1x4x110x4xbf16, #tpu.memory_space<vmem>>, vector<1x1x80x4xbf16>
    %10 = vector.shape_cast %9 : vector<1x1x80x4xbf16> to vector<80x4xbf16>
    %c1_11 = arith.constant 1 : index
    %c0_12 = arith.constant 0 : index
    %c0_13 = arith.constant 0 : index
    %11 = vector.load %arg2[%c1_11, %c0_12, %c0_13] : memref<9x4x128xbf16, #tpu.memory_space<vmem>>, vector<1x4x128xbf16>
    %12 = vector.shape_cast %11 : vector<1x4x128xbf16> to vector<4x128xbf16>
    %cst_14 = arith.constant dense<0.000000e+00> : vector<80x128xf32>
    %13 = tpu.matmul %10, %12, %cst_14 {dimension_numbers = #tpu.dot_dimension_numbers<[1], [0], [0], [1], [0, 0, 1, 1], [], []>} : vector<80x4xbf16>, vector<4x128xbf16>, vector<80x128xf32> -> vector<80x128xf32>
    %14 = arith.addf %8, %13 : vector<80x128xf32>
    %c0_15 = arith.constant 0 : index
    %c0_16 = arith.constant 0 : index
    %c1_17 = arith.constant 1 : index
    %c0_18 = arith.constant 0 : index
    %15 = vector.load %arg1[%c0_15, %c0_16, %c1_17, %c0_18] : memref<1x4x110x4xbf16, #tpu.memory_space<vmem>>, vector<1x1x80x4xbf16>
    %16 = vector.shape_cast %15 : vector<1x1x80x4xbf16> to vector<80x4xbf16>
    %c2 = arith.constant 2 : index
    %c0_19 = arith.constant 0 : index
    %c0_20 = arith.constant 0 : index
    %17 = vector.load %arg2[%c2, %c0_19, %c0_20] : memref<9x4x128xbf16, #tpu.memory_space<vmem>>, vector<1x4x128xbf16>
    %18 = vector.shape_cast %17 : vector<1x4x128xbf16> to vector<4x128xbf16>
    %cst_21 = arith.constant dense<0.000000e+00> : vector<80x128xf32>
    %19 = tpu.matmul %16, %18, %cst_21 {dimension_numbers = #tpu.dot_dimension_numbers<[1], [0], [0], [1], [0, 0, 1, 1], [], []>} : vector<80x4xbf16>, vector<4x128xbf16>, vector<80x128xf32> -> vector<80x128xf32>
    %20 = arith.addf %14, %19 : vector<80x128xf32>
    %c0_22 = arith.constant 0 : index
    %c2_23 = arith.constant 2 : index
    %c0_24 = arith.constant 0 : index
    %c0_25 = arith.constant 0 : index
    %21 = vector.load %arg1[%c0_22, %c2_23, %c0_24, %c0_25] : memref<1x4x110x4xbf16, #tpu.memory_space<vmem>>, vector<1x1x80x4xbf16>
    %22 = vector.shape_cast %21 : vector<1x1x80x4xbf16> to vector<80x4xbf16>
    %c3 = arith.constant 3 : index
    %c0_26 = arith.constant 0 : index
    %c0_27 = arith.constant 0 : index
    %23 = vector.load %arg2[%c3, %c0_26, %c0_27] : memref<9x4x128xbf16, #tpu.memory_space<vmem>>, vector<1x4x128xbf16>
    %24 = vector.shape_cast %23 : vector<1x4x128xbf16> to vector<4x128xbf16>
    %cst_28 = arith.constant dense<0.000000e+00> : vector<80x128xf32>
    %25 = tpu.matmul %22, %24, %cst_28 {dimension_numbers = #tpu.dot_dimension_numbers<[1], [0], [0], [1], [0, 0, 1, 1], [], []>} : vector<80x4xbf16>, vector<4x128xbf16>, vector<80x128xf32> -> vector<80x128xf32>
    %26 = arith.addf %20, %25 : vector<80x128xf32>
    %c0_29 = arith.constant 0 : index
    %c3_30 = arith.constant 3 : index
    %c0_31 = arith.constant 0 : index
    %c0_32 = arith.constant 0 : index
    %27 = vector.load %arg1[%c0_29, %c3_30, %c0_31, %c0_32] : memref<1x4x110x4xbf16, #tpu.memory_space<vmem>>, vector<1x1x80x4xbf16>
    %28 = vector.shape_cast %27 : vector<1x1x80x4xbf16> to vector<80x4xbf16>
    %c4 = arith.constant 4 : index
    %c0_33 = arith.constant 0 : index
    %c0_34 = arith.constant 0 : index
    %29 = vector.load %arg2[%c4, %c0_33, %c0_34] : memref<9x4x128xbf16, #tpu.memory_space<vmem>>, vector<1x4x128xbf16>
    %30 = vector.shape_cast %29 : vector<1x4x128xbf16> to vector<4x128xbf16>
    %cst_35 = arith.constant dense<0.000000e+00> : vector<80x128xf32>
    %31 = tpu.matmul %28, %30, %cst_35 {dimension_numbers = #tpu.dot_dimension_numbers<[1], [0], [0], [1], [0, 0, 1, 1], [], []>} : vector<80x4xbf16>, vector<4x128xbf16>, vector<80x128xf32> -> vector<80x128xf32>
    %32 = arith.addf %26, %31 : vector<80x128xf32>
    %c0_36 = arith.constant 0 : index
    %c2_37 = arith.constant 2 : index
    %c1_38 = arith.constant 1 : index
    %c0_39 = arith.constant 0 : index
    %33 = vector.load %arg1[%c0_36, %c2_37, %c1_38, %c0_39] : memref<1x4x110x4xbf16, #tpu.memory_space<vmem>>, vector<1x1x80x4xbf16>
    %34 = vector.shape_cast %33 : vector<1x1x80x4xbf16> to vector<80x4xbf16>
    %c5 = arith.constant 5 : index
    %c0_40 = arith.constant 0 : index
    %c0_41 = arith.constant 0 : index
    %35 = vector.load %arg2[%c5, %c0_40, %c0_41] : memref<9x4x128xbf16, #tpu.memory_space<vmem>>, vector<1x4x128xbf16>
    %36 = vector.shape_cast %35 : vector<1x4x128xbf16> to vector<4x128xbf16>
    %cst_42 = arith.constant dense<0.000000e+00> : vector<80x128xf32>
    %37 = tpu.matmul %34, %36, %cst_42 {dimension_numbers = #tpu.dot_dimension_numbers<[1], [0], [0], [1], [0, 0, 1, 1], [], []>} : vector<80x4xbf16>, vector<4x128xbf16>, vector<80x128xf32> -> vector<80x128xf32>
    %38 = arith.addf %32, %37 : vector<80x128xf32>
    %c0_43 = arith.constant 0 : index
    %c0_44 = arith.constant 0 : index
    %c10 = arith.constant 10 : index
    %c0_45 = arith.constant 0 : index
    %39 = vector.load %arg1[%c0_43, %c0_44, %c10, %c0_45] : memref<1x4x110x4xbf16, #tpu.memory_space<vmem>>, vector<1x1x80x4xbf16>
    %40 = vector.shape_cast %39 : vector<1x1x80x4xbf16> to vector<80x4xbf16>
    %c6 = arith.constant 6 : index
    %c0_46 = arith.constant 0 : index
    %c0_47 = arith.constant 0 : index
    %41 = vector.load %arg2[%c6, %c0_46, %c0_47] : memref<9x4x128xbf16, #tpu.memory_space<vmem>>, vector<1x4x128xbf16>
    %42 = vector.shape_cast %41 : vector<1x4x128xbf16> to vector<4x128xbf16>
    %cst_48 = arith.constant dense<0.000000e+00> : vector<80x128xf32>
    %43 = tpu.matmul %40, %42, %cst_48 {dimension_numbers = #tpu.dot_dimension_numbers<[1], [0], [0], [1], [0, 0, 1, 1], [], []>} : vector<80x4xbf16>, vector<4x128xbf16>, vector<80x128xf32> -> vector<80x128xf32>
    %44 = arith.addf %38, %43 : vector<80x128xf32>
    %c0_49 = arith.constant 0 : index
    %c1_50 = arith.constant 1 : index
    %c10_51 = arith.constant 10 : index
    %c0_52 = arith.constant 0 : index
    %45 = vector.load %arg1[%c0_49, %c1_50, %c10_51, %c0_52] : memref<1x4x110x4xbf16, #tpu.memory_space<vmem>>, vector<1x1x80x4xbf16>
    %46 = vector.shape_cast %45 : vector<1x1x80x4xbf16> to vector<80x4xbf16>
    %c7 = arith.constant 7 : index
    %c0_53 = arith.constant 0 : index
    %c0_54 = arith.constant 0 : index
    %47 = vector.load %arg2[%c7, %c0_53, %c0_54] : memref<9x4x128xbf16, #tpu.memory_space<vmem>>, vector<1x4x128xbf16>
    %48 = vector.shape_cast %47 : vector<1x4x128xbf16> to vector<4x128xbf16>
    %cst_55 = arith.constant dense<0.000000e+00> : vector<80x128xf32>
    %49 = tpu.matmul %46, %48, %cst_55 {dimension_numbers = #tpu.dot_dimension_numbers<[1], [0], [0], [1], [0, 0, 1, 1], [], []>} : vector<80x4xbf16>, vector<4x128xbf16>, vector<80x128xf32> -> vector<80x128xf32>
    %50 = arith.addf %44, %49 : vector<80x128xf32>
    %c0_56 = arith.constant 0 : index
    %c0_57 = arith.constant 0 : index
    %c11 = arith.constant 11 : index
    %c0_58 = arith.constant 0 : index
    %51 = vector.load %arg1[%c0_56, %c0_57, %c11, %c0_58] : memref<1x4x110x4xbf16, #tpu.memory_space<vmem>>, vector<1x1x80x4xbf16>
    %52 = vector.shape_cast %51 : vector<1x1x80x4xbf16> to vector<80x4xbf16>
    %c8 = arith.constant 8 : index
    %c0_59 = arith.constant 0 : index
    %c0_60 = arith.constant 0 : index
    %53 = vector.load %arg2[%c8, %c0_59, %c0_60] : memref<9x4x128xbf16, #tpu.memory_space<vmem>>, vector<1x4x128xbf16>
    %54 = vector.shape_cast %53 : vector<1x4x128xbf16> to vector<4x128xbf16>
    %cst_61 = arith.constant dense<0.000000e+00> : vector<80x128xf32>
    %55 = tpu.matmul %52, %54, %cst_61 {dimension_numbers = #tpu.dot_dimension_numbers<[1], [0], [0], [1], [0, 0, 1, 1], [], []>} : vector<80x4xbf16>, vector<4x128xbf16>, vector<80x128xf32> -> vector<80x128xf32>
    %56 = arith.addf %50, %55 : vector<80x128xf32>
    %cst_62 = arith.constant 0.000000e+00 : f32
    %57 = vector.broadcast %cst_62 : f32 to vector<80x128xf32>
    %58 = arith.maximumf %56, %57 : vector<80x128xf32>
    %59 = tpu.iota {dimensions = array<i32: 0>} : vector<80x1xi32>
    %c10_i32 = arith.constant 10 : i32
    %c0_i32 = arith.constant 0 : i32
    %60 = arith.cmpi eq, %c10_i32, %c0_i32 : i32
    %c1_i32 = arith.constant 1 : i32
    %61 = arith.select %60, %c1_i32, %c10_i32 : i32
    %62 = vector.broadcast %61 : i32 to vector<80x1xi32>
    %63 = arith.remsi %59, %62 : vector<80x1xi32>
    %c0_i32_63 = arith.constant 0 : i32
    %64 = vector.broadcast %c0_i32_63 : i32 to vector<80x1xi32>
    %65 = arith.cmpi ne, %63, %64 : vector<80x1xi32>
    %c0_i32_64 = arith.constant 0 : i32
    %66 = vector.broadcast %c0_i32_64 : i32 to vector<80x1xi32>
    %67 = arith.cmpi slt, %63, %66 : vector<80x1xi32>
    %c0_i32_65 = arith.constant 0 : i32
    %68 = arith.cmpi slt, %61, %c0_i32_65 : i32
    %69 = vector.broadcast %68 : i1 to vector<80x1xi1>
    %70 = vector.broadcast %69 : vector<80x1xi1> to vector<80x1xi1>
    %71 = arith.xori %67, %70 : vector<80x1xi1>
    %72 = arith.andi %71, %65 : vector<80x1xi1>
    %73 = vector.broadcast %61 : i32 to vector<80x1xi32>
    %74 = arith.addi %63, %73 : vector<80x1xi32>
    %75 = arith.select %72, %74, %63 : vector<80x1xi1>, vector<80x1xi32>
    %c8_i32 = arith.constant 8 : i32
    %76 = vector.broadcast %c8_i32 : i32 to vector<80x1xi32>
    %77 = arith.cmpi slt, %75, %76 : vector<80x1xi32>
    %cst_66 = arith.constant 0.000000e+00 : f32
    %78 = vector.shape_cast %77 : vector<80x1xi1> to vector<80x1xi1>
    %79 = vector.broadcast %78 : vector<80x1xi1> to vector<80x128xi1>
    %80 = vector.broadcast %cst_66 : f32 to vector<80x128xf32>
    %81 = arith.select %79, %58, %80 : vector<80x128xi1>, vector<80x128xf32>
    %82 = arith.truncf %81 : vector<80x128xf32> to vector<80x128xbf16>
    %cst_67 = arith.constant 0.000000e+00 : bf16
    %83 = vector.broadcast %cst_67 : bf16 to vector<1x110x128xbf16>
    %c0_68 = arith.constant 0 : index
    %c0_69 = arith.constant 0 : index
    %c0_70 = arith.constant 0 : index
    %84 = vector.load %arg4[%c0_68, %c0_69, %c0_70] : memref<1x110x128xbf16, #tpu.memory_space<vmem>>, vector<1x110x128xbf16>
    tpu.vector_store %arg4[%c0_68, %c0_69, %c0_70], %83 {strides = array<i32>} : memref<1x110x128xbf16, #tpu.memory_space<vmem>>, vector<1x110x128xbf16>,
    %c0_71 = arith.constant 0 : index
    %c11_72 = arith.constant 11 : index
    %c0_73 = arith.constant 0 : index
    %85 = vector.load %arg4[%c0_71, %c11_72, %c0_73] : memref<1x110x128xbf16, #tpu.memory_space<vmem>>, vector<1x80x128xbf16>
    %86 = vector.shape_cast %85 : vector<1x80x128xbf16> to vector<80x128xbf16>
    %87 = vector.shape_cast %82 : vector<80x128xbf16> to vector<1x80x128xbf16>
    tpu.vector_store %arg4[%c0_71, %c11_72, %c0_73], %87 {strides = array<i32>} : memref<1x110x128xbf16, #tpu.memory_space<vmem>>, vector<1x80x128xbf16>,
    return
  }
  func.func @transform_0(%arg0: i32) -> (i32, i32, i32, i32) {
    %c0_i32 = arith.constant 0 : i32
    %c0_i32_0 = arith.constant 0 : i32
    %c0_i32_1 = arith.constant 0 : i32
    %c0_i32_2 = arith.constant 0 : i32
    return %arg0, %c0_i32, %c0_i32_0, %c0_i32_1 : i32, i32, i32, i32
  }
  func.func @transform_1(%arg0: i32) -> (i32, i32, i32) {
    %c0_i32 = arith.constant 0 : i32
    %c0_i32_0 = arith.constant 0 : i32
    %c0_i32_1 = arith.constant 0 : i32
    %c0_i32_2 = arith.constant 0 : i32
    return %c0_i32, %c0_i32_0, %c0_i32_1 : i32, i32, i32
  }
  func.func @transform_2(%arg0: i32) -> (i32, i32) {
    %c0_i32 = arith.constant 0 : i32
    %c0_i32_0 = arith.constant 0 : i32
    %c0_i32_1 = arith.constant 0 : i32
    return %c0_i32, %c0_i32_0 : i32, i32
  }
  func.func @transform_3(%arg0: i32) -> (i32, i32, i32) {
    %c0_i32 = arith.constant 0 : i32
    %c0_i32_0 = arith.constant 0 : i32
    %c0_i32_1 = arith.constant 0 : i32
    return %arg0, %c0_i32, %c0_i32_0 : i32, i32, i32
  }
}

</mosaic_0001>

<bundles_post_ra>
// kernel: tpu_custom_call.1
= control target key start
LH: loop header
LB: loop body
LE: loop exit
PB: predicated region body
PF: predicated region fallthrough
CT: control target
= control target key end

     0   :  { %s2193_s12 = smov 0   ;;  %s2864_s0 = inlined_call_operand.vmem [shape: bf16[2,4,110,4], index: 0, kind: input, shape index: {}]   ;;  %s2865_s1 = inlined_call_operand.vmem [shape: bf16[9,4,128], index: 1, kind: input, shape index: {}]   ;;  %s2866_s2 = inlined_call_operand.vmem [shape: f32[1,128], index: 2, kind: input, shape index: {}]   ;;  %s2867_s3 = inlined_call_operand.vmem [shape: bf16[2,110,128], index: 3, kind: output, shape index: {}]  }
   0x1 LB: > { %s1835_s13 = sadd.s32 4294967295, %s2170_s12   ;;  %p1839_p0 = scmp.ge.s32.totalorder %s2170_s12, 1  ;;  %s2170_s12 = sphi %s2193_s12, %s13_s12  }
   0x2   : > { %p137_p1 = scmp.lt.s32.totalorder %s2170_s12, 3 }
   0x4   : > { %p138_p2 = pnand %p1839_p0, %p137_p1 }
   0x5   : > { %p161_p3 = scmp.lt.s32.totalorder (!%p138_p2), %s1835_s13, 1 }
   0x6   : > { %141 = sbr.rel (%p138_p2) target bundleno = 356 (0x164), region = 32 }
   0xb   : > { %v186_v0 = vld [vmem:[%s2865_s1] sm:$0x3]  ;;  %vm228_vm0 = vcmask 1041408   ;;  %v1903_v2 = vld [vmem:[%s2865_s1 + $0x4] sm:$0x3]  ;;  %s2903_s13 = smov (!%p161_p3, %s1835_s13), 1 }
   0xc   : > { %v230_v1 = vsel %vm228_vm0, %v186_v0, 0  ;;  %v1877_v3 = vld [vmem:[%s2865_s1 + $0x2] sm:$0x3]  ;;  %v478_v4 = vsel %vm228_vm0, %v1903_v2, 0  ;;  %v1939_v6 = vld [vmem:[%s2865_s1 + $0x6] sm:$0x3] }
   0xd   : > { %2149 = vmatpush.bf16.msra.mxu1 %v230_v1  ;;  %2150 = vmatpush.bf16.msra.mxu2 %v230_v1  ;;  %v330_v5 = vsel %vm228_vm0, %v1877_v3, 0  ;;  %v578_v7 = vsel %vm228_vm0, %v1939_v6, 0  ;;  %v1975_v8 = vld [vmem:[%s2865_s1 + $0x8] sm:$0x3]  ;;  %s2152_s24 = smul.u32 224, %s2903_s13  ;;  %vm212_vm1 = vcmask 31744  }
   0xe   : > { %2151 = vmatpush.bf16.msra.mxu3 %v230_v1  ;;  %239 = vmatpush.bf16.msra.mxu0 %v230_v1  ;;  %v678_v9 = vsel %vm228_vm0, %v1975_v8, 0  ;;  %v2038_v14 = vld [vmem:[%s2865_s1 + $0xc] sm:$0x3]  ;;  %v2075_v16 = vld [vmem:[%s2865_s1 + $0xe] sm:$0x3]  ;;  %vm912_vm3 = vcmask 1046528  }
   0xf   : > { %s2227_s27 = scalar_lea.vmem %s2864_s0, %s2152_s24  ;;  %v940_v15 = vsel %vm228_vm0, %v2038_v14, 0  ;;  %v1054_v17 = vsel %vm228_vm0, %v2075_v16, 0  ;;  %v2012_v18 = vld [vmem:[%s2865_s1 + $0xa] sm:$0x3]  ;;  %v2101_v19 = vld [vmem:[%s2865_s1 + $0x10] sm:$0x3] }
  0x10   : > { %v2110_v10 = vld [vmem:[%s2227_s27 + $0x8] sm:$0xff]  ;;  %v2111_v11 = vld [vmem:[%s2227_s27 + $0x10] sm:$0xff]  ;;  %v2113_v12 = vld [vmem:[%s2227_s27 + $0x20] sm:$0xff]  ;;  %v825_v20 = vsel %vm228_vm0, %v2012_v18, 0  ;;  %v1176_v21 = vsel %vm228_vm0, %v2101_v19, 0  ;;  %s2153_s11 = smul.u32 56, %s2903_s13 }
  0x11   : > { %487 = vmatpush.bf16.msrb.mxu2 %v478_v4  ;;  %339 = vmatpush.bf16.msrb.mxu1 %v330_v5  ;;  %v2109_v13 = vld [vmem:[%s2227_s27] sm:$0xff]  ;;  %v2112_v22 = vld [vmem:[%s2227_s27 + $0x18] sm:$0xff]  ;;  %v2124_v24 = vld [vmem:[%s2227_s27 + $0x70] sm:$0xff]  ;;  %vm417_vm2 = vsmask.f32 7424 }
  0x12   : > { %587 = vmatpush.bf16.msrb.mxu3 %v578_v7  ;;  %687 = vmatpush.bf16.msrb.mxu0 %v678_v9  ;;  %v2114_v23 = vld [vmem:[%s2227_s27 + $0x38] sm:$0xff]  ;;  %v2119_v25 = vld [vmem:[%s2227_s27] sm:$0xff]  ;;  %v2129_v26 = vld [vmem:[%s2227_s27 + $0xa8] sm:$0xff]  ;;  %vm1106_vm4 = vsmask.f32 6400  ;;  %s2444_s13 = scalar_lea.vmem %s2867_s3, %s2153_s11 }
  0x13   : > { %1863 = vmatmul.msk.bf16.vlgmr.msra.gmra.mxu1 %vm212_vm1, %v2110_v10  ;;  %1864 = vmatmul.msk.bf16.vlgmr.msra.gmra.mxu2 %vm212_vm1, %v2111_v11  ;;  %v2120_v27 = vld [vmem:[%s2227_s27 + $0x8] sm:$0xff]  ;;  %v421_v28 = vshll.u32 %v2119_v25, 16  ;;  %v419_v29 = vshrl.u32 %v2119_v25, 16  ;;  %v2115_v34 = vld [vmem:[%s2227_s27 + $0x40] sm:$0xff]  ;;  %v2125_v36 = vld [vmem:[%s2227_s27 + $0x78] sm:$0xff] }
  0x14   : > { %1866 = vmatmul.msk.bf16.vlgmr.msra.gmra.mxu3 %vm212_vm1, %v2113_v12  ;;  %1862 = vmatmul.msk.bf16.vlgmr.msra.gmra.mxu0 %vm212_vm1, %v2109_v13  ;;  %v426_v31 = vshll.u32 %v2120_v27, 16  ;;  %v2130_v37 = vld [vmem:[%s2227_s27 + $0xb0] sm:$0xff]  ;;  %v430_v39 = vshrl.u32 %v2120_v27, 16  ;;  %v2116_v43 = vld [vmem:[%s2227_s27 + $0x48] sm:$0xff]  ;;  %v2126_v45 = vld [vmem:[%s2227_s27 + $0x80] sm:$0xff] }
  0x15   : > { %949 = vmatpush.bf16.msra.mxu2 %v940_v15  ;;  %834 = vmatpush.bf16.msra.mxu1 %v825_v20  ;;  %v423_v30 = vrot.slane %v421_v28, 1  ;;  %v2121_v38 = vld [vmem:[%s2227_s27 + $0x10] sm:$0xff]  ;;  %v2131_v46 = vld [vmem:[%s2227_s27 + $0xb8] sm:$0xff]  ;;  %v2127_v54 = vld [vmem:[%s2227_s27 + $0x88] sm:$0xff] }
  0x16   : > { %1063 = vmatpush.bf16.msra.mxu3 %v1054_v17  ;;  %1185 = vmatpush.bf16.msra.mxu0 %v1176_v21  ;;  %v428_v33 = vrot.slane %v426_v31, 1  ;;  %v434_v40 = vshll.u32 %v2121_v38, 16  ;;  %v2122_v47 = vld [vmem:[%s2227_s27 + $0x18] sm:$0xff]  ;;  %v438_v48 = vshrl.u32 %v2121_v38, 16  ;;  %v2117_v52 = vld [vmem:[%s2227_s27 + $0x50] sm:$0xff]  ;;  %v2132_v55 = vld [vmem:[%s2227_s27 + $0xc0] sm:$0xff] }
  0x17   : > { %v424_v32 = vor.u32 %v423_v30, %v419_v29  ;;  %v442_v49 = vshll.u32 %v2122_v47, 16  ;;  %v2123_v56 = vld [vmem:[%s2227_s27 + $0x20] sm:$0xff]  ;;  %v446_v57 = vshrl.u32 %v2122_v47, 16  ;;  %v386_v61 = vld [vmem:[%s2227_s27 + $0x28] sm:$0x1]  ;;  %v2118_v0 = vld [vmem:[%s2227_s27 + $0x58] sm:$0xff] }
  0x18   : > { %v432_v41 = vor.u32 %v430_v39, %v428_v33  ;;  %v436_v42 = vrot.slane %v434_v40, 1  ;;  %v450_v58 = vshll.u32 %v2123_v56, 16  ;;  %v2041_v62 = vld [vmem:[%s2227_s27 + $0x4] sm:$0xe]  ;;  %v2139_v63 = vld [vmem:[%s2227_s27 + $0x4] sm:$0xf0]  ;;  %v410_v1 = vunpack.c.l.b16 %v386_v61 }
  0x19   : > { %v429_v35 = vsel %vm417_vm2, %v424_v32, %v428_v33  ;;  %v444_v51 = vrot.slane %v442_v49, 1  ;;  %v2128_v3 = vld [vmem:[%s2227_s27 + $0x90] sm:$0xff]  ;;  %v2133_v5 = vld [vmem:[%s2227_s27 + $0xc8] sm:$0xff]  ;;  %v2042_v7 = vor.u32 %v2139_v63, %v2041_v62  ;;  %v2135_v9 = vld [vmem:[%s2227_s27 + $0x78] sm:$0xff]  ;;  %v454_v17 = vshrl.u32 %v2123_v56, 16 }
  0x1a   : > { %v437_v44 = vsel %vm417_vm2, %v432_v41, %v436_v42  ;;  %v440_v50 = vor.u32 %v438_v48, %v436_v42  ;;  %v452_v60 = vrot.slane %v450_v58, 1  ;;  %v2134_v4 = vld [vmem:[%s2227_s27 + $0x70] sm:$0xff]  ;;  %v416_v8 = vpack.c.b16 %v410_v1, %v410_v1  ;;  %v2078_v11 = vld [vmem:[%s2227_s27 + $0x3c] sm:$0xe]  ;;  %v2144_v12 = vld [vmem:[%s2227_s27 + $0x3c] sm:$0xf0] }
  0x1b   : > { %v448_v59 = vor.u32 %v446_v57, %v444_v51  ;;  %v2299_v6 = vld [vmem:[%s2227_s27 + $0xc] sm:$0xff]  ;;  %v768_v10 = vshll.u32 %v2134_v4, 16  ;;  %v1108_v13 = vshrl.u32 %v2042_v7, 16  ;;  %v1111_v14 = vshll.u32 %v2042_v7, 16  ;;  %v2316_v40 = vld [vmem:[%s2227_s27 + $0x14] sm:$0xff]  ;;  %v2136_v41 = vld [vmem:[%s2227_s27 + $0x80] sm:$0xff] }
  0x1c   : > { %v445_v53 = vsel %vm417_vm2, %v440_v50, %v444_v51  ;;  %v1116_v15 = vshrl.u32 %v2299_v6, 16  ;;  %v1119_v16 = vshll.u32 %v2299_v6, 16  ;;  %v458_v18 = vshll.u32 %v416_v8, 16  ;;  %v2147_v1 = vld [vmem:[%s2227_s27 + $0x54] sm:$0xff] }
  0x1d   : > { %v453_v2 = vsel %vm417_vm2, %v448_v59, %v452_v60  ;;  %v766_v19 = vshrl.u32 %v2134_v4, 16  ;;  %v770_v20 = vrot.slane %v768_v10, 1  ;;  %v773_v21 = vshll.u32 %v2135_v9, 16  ;;  %v2332_v59 = vld [vmem:[%s2227_s27 + $0x1c] sm:$0xff] }
  0x1e   : > { %v1113_v25 = vrot.slane %v1111_v14, 2  ;;  %v1121_v27 = vrot.slane %v1119_v16, 2  ;;  %v456_v28 = vor.u32 %v454_v17, %v452_v60  ;;  %v460_v29 = vrot.slane %v458_v18, 1  ;;  %v2137_v60 = vld [vmem:[%s2227_s27 + $0x88] sm:$0xff]  ;;  %v2138_v16 = vld [vmem:[%s2227_s27 + $0x90] sm:$0xff] }
  0x1f   : > { %v771_v30 = vor.u32 %v770_v20, %v766_v19  ;;  %v775_v31 = vrot.slane %v773_v21, 1  ;;  %v1125_v42 = vshrl.u32 %v2316_v40, 16  ;;  %v913_v51 = vrot.slane %v2042_v7, 1  ;;  %v2362_v19 = vld [vmem:[%s2866_s2] ss:$0 sm:$0xff] }
  0x20   : > { %v1134_v61 = vshrl.u32 %v2332_v59, 16  ;;  %v1137_v62 = vshll.u32 %v2332_v59, 16  ;;  %v785_v63 = vshrl.u32 %v2136_v41, 16  ;;  %v1032_v7 = vrot.slane %v2147_v1, 1 }
  0x21   : > { %v1127_v47 = vrot.slane %v1125_v42, 1 }
  0x23   : > { %1865 = vmatmul.msk.bf16.gmra.mxu2 %vm212_vm1, %v2112_v22  ;;  %1898 = vmatmul.msk.bf16.vlgmr.msrb.gmra.mxu1 %vm212_vm1, %v2114_v23  ;;  %v2079_v22 = vor.u32 %v2144_v12, %v2078_v11  ;;  %v2145_v23 = vld [vmem:[%s2227_s27 + $0x44] sm:$0xff] }
  0x24   : > { %1960 = vmatmul.msk.bf16.vlgmr.msrb.gmra.mxu3 %vm212_vm1, %v2124_v24  ;;  %1996 = vmatmul.msk.bf16.vlgmr.msrb.gmra.mxu0 %vm212_vm1, %v2129_v26  ;;  %v1110_v24 = vrot.slane %v1108_v13, 1  ;;  %v1118_v26 = vrot.slane %v1116_v15, 1  ;;  %v1028_v33 = vrot.slane %v2145_v23, 1  ;;  %v2350_v15 = vld [vmem:[%s2227_s27 + $0x24] sm:$0xff] }
  0x25   : > { %v1027_v32 = vrot.slane %v2079_v22, 1  ;;  %v1143_v17 = vshrl.u32 %v2350_v15, 16  ;;  %v1146_v18 = vshll.u32 %v2350_v15, 16 }
  0x27   : > { %v1029_v38 = vsel %vm912_vm3, %v1027_v32, %v1028_v33 }
  0x33   : > { %1899 = vmatmul.msk.bf16.gmra.mxu1 %vm212_vm1, %v2115_v34  ;;  %1924 = vmatmul.msk.bf16.vlgmr.msrb.gmra.mxu2 %vm212_vm1, %v429_v35  ;;  %v1114_v34 = vor.u32 %v1113_v25, %v1110_v24  ;;  %v1122_v35 = vor.u32 %v1121_v27, %v1118_v26  ;;  %v793_v24 = vshrl.u32 %v2137_v60, 16  ;;  %v797_v25 = vshll.u32 %v2138_v16, 16  ;;  %v2148_v27 = vld [vmem:[%s2227_s27 + $0x5c] sm:$0xff] }
  0x34   : > { %1961 = vmatmul.msk.bf16.gmra.mxu3 %vm212_vm1, %v2125_v36  ;;  %1997 = vmatmul.msk.bf16.gmra.mxu0 %vm212_vm1, %v2130_v37  ;;  %v461_v36 = vsel %vm417_vm2, %v456_v28, %v460_v29  ;;  %v776_v37 = vsel %vm417_vm2, %v771_v30, %v775_v31  ;;  %v1145_v28 = vrot.slane %v1143_v17, 1  ;;  %v1148_v29 = vrot.slane %v1146_v18, 2  ;;  %v1100_v30 = vld [vmem:[%s2227_s27 + $0x2c] sm:$0x3] }
  0x35   : > { %v1123_v39 = vsel %vm1106_vm4, %v1114_v34, %v1122_v35  ;;  %v799_v32 = vrot.slane %v797_v25, 1 }
  0x43   : > { %1900 = vmatmul.msk.bf16.gmra.mxu1 %vm212_vm1, %v2116_v43  ;;  %1925 = vmatmul.msk.bf16.gmra.mxu2 %vm212_vm1, %v437_v44  ;;  %v1128_v43 = vshll.u32 %v2316_v40, 16  ;;  %v777_v44 = vshrl.u32 %v2135_v9, 16 }
  0x44   : > { %1962 = vmatmul.msk.bf16.gmra.mxu3 %vm212_vm1, %v2126_v45  ;;  %1998 = vmatmul.msk.bf16.gmra.mxu0 %vm212_vm1, %v2131_v46  ;;  %v781_v45 = vshll.u32 %v2136_v41, 16  ;;  %v2146_v46 = vld [vmem:[%s2227_s27 + $0x4c] sm:$0xff] }
  0x45   : > { %v1130_v48 = vrot.slane %v1128_v43, 2  ;;  %v779_v49 = vor.u32 %v777_v44, %v775_v31 }
  0x46   : > { %v783_v50 = vrot.slane %v781_v45, 1 }
  0x48   : > { %v787_v4 = vor.u32 %v785_v63, %v783_v50 }
  0x53   : > { %1901 = vmatmul.msk.bf16.gmra.mxu1 %vm212_vm1, %v2117_v52  ;;  %1926 = vmatmul.msk.bf16.gmra.mxu2 %vm212_vm1, %v445_v53  ;;  %v914_v52 = vrot.slane %v2299_v6, 1  ;;  %v1030_v53 = vrot.slane %v2146_v46, 1  ;;  %v916_v6 = vrot.slane %v2316_v40, 1 }
  0x54   : > { %1963 = vmatmul.msk.bf16.gmra.mxu3 %vm212_vm1, %v2127_v54  ;;  %1999 = vmatmul.msk.bf16.gmra.mxu0 %vm212_vm1, %v2132_v55  ;;  %v1131_v54 = vor.u32 %v1130_v48, %v1127_v47  ;;  %v784_v55 = vsel %vm417_vm2, %v779_v49, %v783_v50 }
  0x55   : > { %v915_v56 = vsel %vm912_vm3, %v913_v51, %v914_v52  ;;  %v1031_v57 = vsel %vm912_vm3, %v1028_v33, %v1030_v53  ;;  %v917_v11 = vsel %vm912_vm3, %v914_v52, %v916_v6  ;;  %v1033_v12 = vsel %vm912_vm3, %v1030_v53, %v1032_v7  ;;  %v2074_v51 = vld [vmem:[%s2227_s27 + $0x64] sm:$0x1] }
  0x56   : > { %v1132_v58 = vsel %vm1106_vm4, %v1122_v35, %v1131_v54  ;;  %v918_v33 = vrot.slane %v2332_v59, 1  ;;  %v1034_v35 = vrot.slane %v2148_v27, 1 }
  0x58   : > { %v919_v43 = vsel %vm912_vm3, %v916_v6, %v918_v33  ;;  %v1035_v46 = vsel %vm912_vm3, %v1032_v7, %v1034_v35 }
  0x63   : > { %1902 = vmatmul.msk.bf16.gmra.mxu1 %vm212_vm1, %v2118_v0  ;;  %1927 = vmatmul.msk.bf16.gmra.mxu2 %vm212_vm1, %v453_v2  ;;  %v789_v0 = vshll.u32 %v2137_v60, 16  ;;  %v1136_v2 = vrot.slane %v1134_v61, 1  ;;  %v801_v60 = vshrl.u32 %v2138_v16, 16 }
  0x64   : > { %1964 = vmatmul.msk.bf16.gmra.mxu3 %vm212_vm1, %v2128_v3  ;;  %2000 = vmatmul.msk.bf16.gmra.mxu0 %vm212_vm1, %v2133_v5  ;;  %v1139_v3 = vrot.slane %v1137_v62, 2 }
  0x65   : > { %v791_v5 = vrot.slane %v789_v0, 1 }
  0x66   : > { %v1140_v8 = vor.u32 %v1139_v3, %v1136_v2  ;;  %v803_v3 = vor.u32 %v801_v60, %v799_v32 }
  0x67   : > { %v792_v10 = vsel %vm417_vm2, %v787_v4, %v791_v5  ;;  %v795_v31 = vor.u32 %v793_v24, %v791_v5  ;;  %v920_v5 = vrot.slane %v2350_v15, 1 }
  0x68   : > { %v1141_v14 = vsel %vm1106_vm4, %v1131_v54, %v1140_v8  ;;  %v1020_v54 = vunpack.c.l.b16 %v2074_v51 }
  0x69   : > { %v800_v42 = vsel %vm417_vm2, %v795_v31, %v799_v32 }
  0x6a   : > { %v1026_v63 = vpack.c.b16 %v1020_v54, %v1020_v54 }
  0x6c   : > { %v1036_v6 = vrot.slane %v1026_v63, 1 }
  0x6e   : > { %v1037_v17 = vsel %vm912_vm3, %v1034_v35, %v1036_v6 }
  0x73   : > { %1928 = vmatmul.msk.bf16.gmra.mxu2 %vm212_vm1, %v461_v36  ;;  %2033 = vmatmul.msk.bf16.vlgmr.msra.gmra.mxu1 %vm212_vm1, %v776_v37  ;;  %v2011_v36 = vld [vmem:[%s2227_s27 + $0x98] sm:$0x1]  ;;  %v1149_v37 = vor.u32 %v1148_v29, %v1145_v28 }
  0x74   : > { %2096 = vmatmul.msk.bf16.vlgmr.msra.gmra.mxu3 %vm212_vm1, %v1029_v38  ;;  %2102 = vmatmul.msk.bf16.vlgmr.msra.gmra.mxu0 %vm212_vm1, %v1123_v39  ;;  %v1104_v38 = vunpack.c.l.b16 %v1100_v30  ;;  %v758_v45 = vunpack.c.l.b16 %v2011_v36 }
  0x75   : > { %v1150_v48 = vsel %vm1106_vm4, %v1140_v8, %v1149_v37 }
  0x76   : > { %v1105_v50 = vpack.c.b16 %v1104_v38, %v1104_v38  ;;  %v764_v52 = vpack.c.b16 %v758_v45, %v758_v45 }
  0x78   : > { %v805_v61 = vshll.u32 %v764_v52, 16 }
  0x7a   : > { %v807_v4 = vrot.slane %v805_v61, 1 }
  0x83   : > { %2034 = vmatmul.msk.bf16.gmra.mxu1 %vm212_vm1, %v784_v55  ;;  %2059 = vmatmul.msk.bf16.vlgmr.msra.gmra.mxu2 %vm212_vm1, %v915_v56  ;;  %v1152_v55 = vshrl.u32 %v1105_v50, 16  ;;  %v1155_v56 = vshll.u32 %v1105_v50, 16 }
  0x84   : > { %2097 = vmatmul.msk.bf16.gmra.mxu3 %vm212_vm1, %v1031_v57  ;;  %2103 = vmatmul.msk.bf16.gmra.mxu0 %vm212_vm1, %v1132_v58 }
  0x85   : > { %v1154_v1 = vrot.slane %v1152_v55, 1  ;;  %v1157_v2 = vrot.slane %v1155_v56, 2 }
  0x87   : > { %v1158_v7 = vor.u32 %v1157_v2, %v1154_v1 }
  0x89   : > { %v1159_v24 = vsel %vm1106_vm4, %v1149_v37, %v1158_v7 }
  0x90   : > { %v2343_v9 = vpop.f32.mrf.mxu1 }
  0x91   : > { %v241_v13 = vpop.f32.mrf.mxu0 }
  0x92   : > { %v266_v34 = vadd.f32 %v2362_v19, %v241_v13  ;;  %v808_v13 = vsel %vm417_vm2, %v803_v3, %v807_v4 }
  0x93   : > { %2035 = vmatmul.msk.bf16.gmra.mxu1 %vm212_vm1, %v792_v10  ;;  %2060 = vmatmul.msk.bf16.gmra.mxu2 %vm212_vm1, %v917_v11  ;;  %v268_v10 = vadd.f32 %v2362_v19, %v2343_v9 }
  0x94   : > { %2098 = vmatmul.msk.bf16.gmra.mxu3 %vm212_vm1, %v1033_v12  ;;  %2104 = vmatmul.msk.bf16.gmra.mxu0 %vm212_vm1, %v1141_v14  ;;  %v921_v14 = vsel %vm912_vm3, %v918_v33, %v920_v5 }
  0x96   : > { %v2364_v20 = vpop.f32.mrf.mxu2 }
  0x97   : > { %v261_v21 = vpop.f32.mrf.mxu3  ;;  %v270_v36 = vadd.f32 %v2362_v19, %v2364_v20 }
  0x98   : > { %v2366_v22 = vpop.f32.mrf.mxu1  ;;  %v2369_v23 = vadd.f32 %v2362_v19, %v261_v21  ;;  %v881_v21 = vld [vmem:[%s2227_s27 + $0x2c] sm:$0x1] }
  0x99   : > { %v243_v26 = vpop.f32.mrf.mxu0  ;;  %v905_v9 = vunpack.c.l.b16 %v881_v21  ;;  %v269_v25 = vadd.f32 %v2362_v19, %v2366_v22  ;;  %v2172_v21 = vmov 0  }
  0x9a   : > { %v267_v53 = vadd.f32 %v2362_v19, %v243_v26  ;;  %1633 = vst [vmem:[%s2444_s13] sm:$0xf] %v2172_v21 }
  0x9b   : > { %v911_v29 = vpack.c.b16 %v905_v9, %v905_v9  ;;  %1634 = vst [vmem:[%s2444_s13 + $0x4] sm:$0xf] %v2172_v21 }
  0x9c   : > { %1645 = vst [vmem:[%s2444_s13 + $0x30] sm:$0xf] %v2172_v21 }
  0x9d   : > { %1646 = vst [vmem:[%s2444_s13 + $0x34] sm:$0x7] %v2172_v21 }
  0x9e   : > { %v2376_v39 = vpop.f32.mrf.mxu2  ;;  %1635 = vst [vmem:[%s2444_s13 + $0x8] sm:$0xf] %v2172_v21 }
  0x9f   : > { %v263_v40 = vpop.f32.mrf.mxu3  ;;  %1636 = vst [vmem:[%s2444_s13 + $0xc] sm:$0xf] %v2172_v21 }
  0xa0   : > { %v341_v41 = vpop.f32.mrf.mxu1  ;;  %v2381_v44 = vadd.f32 %v2362_v19, %v263_v40  ;;  %1637 = vst [vmem:[%s2444_s13 + $0x10] sm:$0xf] %v2172_v21 }
  0xa1   : > { %v689_v47 = vpop.f32.mrf.mxu0  ;;  %v366_v49 = vadd.f32 %v341_v41, %v266_v34  ;;  %v922_v34 = vrot.slane %v911_v29, 1  ;;  %1638 = vst [vmem:[%s2444_s13 + $0x14] sm:$0xf] %v2172_v21 }
  0xa2   : > { %1639 = vst [vmem:[%s2444_s13 + $0x18] sm:$0xf] %v2172_v21 }
  0xa3   : > { %2036 = vmatmul.msk.bf16.gmra.mxu1 %vm212_vm1, %v800_v42  ;;  %2061 = vmatmul.msk.bf16.gmra.mxu2 %vm212_vm1, %v919_v43  ;;  %v923_v41 = vsel %vm912_vm3, %v920_v5, %v922_v34  ;;  %1640 = vst [vmem:[%s2444_s13 + $0x1c] sm:$0xf] %v2172_v21 }
  0xa4   : > { %2099 = vmatmul.msk.bf16.gmra.mxu3 %vm212_vm1, %v1035_v46  ;;  %2105 = vmatmul.msk.bf16.gmra.mxu0 %vm212_vm1, %v1150_v48  ;;  %1641 = vst [vmem:[%s2444_s13 + $0x20] sm:$0xf] %v2172_v21 }
  0xa5   : > { %1642 = vst [vmem:[%s2444_s13 + $0x24] sm:$0xf] %v2172_v21 }
  0xa6   : > { %v2391_v57 = vpop.f32.mrf.mxu2  ;;  %1643 = vst [vmem:[%s2444_s13 + $0x28] sm:$0xf] %v2172_v21 }
  0xa7   : > { %v589_v58 = vpop.f32.mrf.mxu3  ;;  %v272_v55 = vadd.f32 %v2362_v19, %v2391_v57  ;;  %1644 = vst [vmem:[%s2444_s13 + $0x2c] sm:$0xf] %v2172_v21 }
  0xa8   : > { %v343_v59 = vpop.f32.mrf.mxu1 }
  0xa9   : > { %v691_v62 = vpop.f32.mrf.mxu0  ;;  %v367_v0 = vadd.f32 %v343_v59, %v267_v53 }
  0xae   : > { %v258_v8 = vpop.f32.mrf.mxu2 }
  0xaf   : > { %v591_v11 = vpop.f32.mrf.mxu3  ;;  %v273_v3 = vadd.f32 %v2362_v19, %v258_v8 }
  0xb0   : > { %v346_v12 = vpop.f32.mrf.mxu1 }
  0xb1   : > { %v368_v16 = vadd.f32 %v346_v12, %v268_v10  ;;  %v694_v18 = vpop.f32.mrf.mxu0 }
  0xb3   : > { %2037 = vmatmul.msk.bf16.gmra.mxu1 %vm212_vm1, %v808_v13  ;;  %2062 = vmatmul.msk.bf16.gmra.mxu2 %vm212_vm1, %v921_v14 }
  0xb4   : > { %2100 = vmatmul.msk.bf16.gmra.mxu3 %vm212_vm1, %v1037_v17  ;;  %2106 = vmatmul.msk.bf16.gmra.mxu0 %vm212_vm1, %v1159_v24 }
  0xb6   : > { %v489_v15 = vpop.f32.mrf.mxu2 }
  0xb7   : > { %v514_v26 = vadd.f32 %v489_v15, %v366_v49  ;;  %v594_v27 = vpop.f32.mrf.mxu3 }
  0xb8   : > { %v348_v28 = vpop.f32.mrf.mxu1 }
  0xb9   : > { %v614_v30 = vadd.f32 %v589_v58, %v514_v26  ;;  %v369_v31 = vadd.f32 %v348_v28, %v269_v25  ;;  %v696_v32 = vpop.f32.mrf.mxu0 }
  0xbb   : > { %v2407_v33 = vadd.f32 %v689_v47, %v614_v30  ;;  %v271_v47 = vadd.f32 %v2362_v19, %v2376_v39 }
  0xbe   : > { %v491_v35 = vpop.f32.mrf.mxu2 }
  0xbf   : > { %v515_v37 = vadd.f32 %v491_v35, %v367_v0  ;;  %v596_v38 = vpop.f32.mrf.mxu3 }
  0xc0   : > { %v351_v40 = vpop.f32.mrf.mxu1 }
  0xc1   : > { %v615_v22 = vadd.f32 %v591_v11, %v515_v37  ;;  %v370_v42 = vadd.f32 %v351_v40, %v270_v36  ;;  %v699_v43 = vpop.f32.mrf.mxu0 }
  0xc3   : > { %2063 = vmatmul.msk.bf16.gmra.mxu2 %vm212_vm1, %v923_v41  ;;  %v2413_v45 = vadd.f32 %v691_v62, %v615_v22  ;;  %v1232_v62 = vlaneseq }
  0xc5   : > { %v2427_v63 = vshrl.u32 %v1232_v62, 7 }
  0xc6   : > { %v494_v46 = vpop.f32.mrf.mxu2 }
  0xc7   : > { %v516_v48 = vadd.f32 %v494_v46, %v368_v16  ;;  %v599_v49 = vpop.f32.mrf.mxu3  ;;  %v1246_v1 = vand.u32 65535, %v2427_v63  ;;  %v1247_v5 = vshrl.u32 %v2427_v63, 16  ;;  %v2447_v17 = vadd.s32 8, %v2427_v63 }
  0xc8   : > { %v353_v50 = vpop.f32.mrf.mxu1 }
  0xc9   : > { %v616_v20 = vadd.f32 %v594_v27, %v516_v48  ;;  %v371_v51 = vadd.f32 %v353_v50, %v271_v47  ;;  %v2417_v52 = vpop.f32.mrf.mxu0  ;;  %v1250_v6 = vmul.u32 52428, %v1246_v1  ;;  %v1249_v12 = vmul.u32 52429, %v1246_v1 }
  0xca   : > { %v1251_v13 = vmul.u32 52429, %v1247_v5  ;;  %v1252_v8 = vmul.u32 52428, %v1247_v5  ;;  %v1275_v15 = vand.u32 65535, %v2447_v17  ;;  %v1276_v30 = vshrl.u32 %v2447_v17, 16 }
  0xcb   : > { %v2419_v53 = vadd.f32 %v694_v18, %v616_v20  ;;  %v1253_v19 = vshll.u32 %v1250_v6, 16  ;;  %v2487_v50 = vadd.s32 16, %v2427_v63 }
  0xcc   : > { %v1255_v16 = vshll.u32 %v1251_v13, 16  ;;  %v1279_v35 = vmul.u32 52428, %v1275_v15  ;;  %v1280_v40 = vmul.u32 52429, %v1276_v30  ;;  %v1256_v22 = vshrl.u32 %v1251_v13, 16 }
  0xcd   : > { %vm1257_vm5 = vc.u32 %v1249_v12, %v1253_v19  ;;  %v1259_v18 = vadd.s32 %v1253_v19, %v1249_v12  ;;  %v1305_v1 = vshrl.u32 %v2487_v50, 16 }
  0xce   : > { %v496_v54 = vpop.f32.mrf.mxu2  ;;  %v1258_v9 = vsel %vm1257_vm5, 1, %v2172_v21  ;;  %v1282_v41 = vshll.u32 %v1279_v35, 16  ;;  %v1284_v47 = vshll.u32 %v1280_v40, 16  ;;  %v1285_v12 = vshrl.u32 %v1280_v40, 16 }
  0xcf   : > { %v517_v56 = vadd.f32 %v496_v54, %v369_v31  ;;  %v601_v58 = vpop.f32.mrf.mxu3  ;;  %v1260_v26 = vadd.s32 %v1258_v9, %v1252_v8  ;;  %vm1261_vm6 = vc.u32 %v1259_v18, %v1255_v16  ;;  %v1309_v5 = vmul.u32 52429, %v1305_v1 }
  0xd0   : > { %v356_v59 = vpop.f32.mrf.mxu1  ;;  %v1262_v29 = vsel %vm1261_vm6, 1, %v2172_v21  ;;  %v1310_v19 = vmul.u32 52428, %v1305_v1  ;;  %v2514_v9 = vadd.s32 24, %v2427_v63 }
  0xd1   : > { %v617_v60 = vadd.f32 %v596_v38, %v517_v56  ;;  %v2423_v61 = vadd.f32 %v356_v59, %v272_v55  ;;  %v2425_v39 = vpop.f32.mrf.mxu0  ;;  %v1264_v34 = vadd.s32 %v1262_v29, %v1260_v26  ;;  %v1278_v38 = vmul.u32 52429, %v1275_v15 }
  0xd2   : > { %v1304_v56 = vand.u32 65535, %v2487_v50  ;;  %v1313_v8 = vshll.u32 %v1309_v5, 16 }
  0xd3   : > { %v2429_v0 = vadd.f32 %v696_v32, %v617_v60  ;;  %v1254_v32 = vshrl.u32 %v1250_v6, 16  ;;  %vm1286_vm7 = vc.u32 %v1278_v38, %v1282_v41  ;;  %v1288_v48 = vadd.s32 %v1282_v41, %v1278_v38 }
  0xd4   : > { %v1283_v60 = vshrl.u32 %v1279_v35, 16  ;;  %v1314_v38 = vshrl.u32 %v1309_v5, 16 }
  0xd5   : > { %vm1290_vm8 = vc.u32 %v1288_v48, %v1284_v47 }
  0xd6   : > { %v499_v2 = vpop.f32.mrf.mxu2  ;;  %v1291_v55 = vsel %vm1290_vm8, 1, %v2172_v21 }
  0xd7   : > { %v518_v57 = vadd.f32 %v499_v2, %v370_v42  ;;  %v2434_v4 = vpop.f32.mrf.mxu3  ;;  %v1281_v42 = vmul.u32 52428, %v1276_v30 }
  0xd8   : > { %v358_v7 = vpop.f32.mrf.mxu1 }
  0xd9   : > { %v618_v10 = vadd.f32 %v599_v49, %v518_v57  ;;  %v2437_v11 = vadd.f32 %v358_v7, %v273_v3  ;;  %v2439_v14 = vpop.f32.mrf.mxu0  ;;  %v1287_v49 = vsel %vm1286_vm7, 1, %v2172_v21  ;;  %v1308_v3 = vmul.u32 52428, %v1304_v56 }
  0xda   : > { %v1307_v57 = vmul.u32 52429, %v1304_v56 }
  0xdb   : > { %v2451_v24 = vadd.f32 %v699_v43, %v618_v10  ;;  %v1311_v6 = vshll.u32 %v1308_v3, 16  ;;  %v1312_v29 = vshrl.u32 %v1308_v3, 16 }
  0xdd   : > { %vm1315_vm9 = vc.u32 %v1307_v57, %v1311_v6  ;;  %v1317_v16 = vadd.s32 %v1311_v6, %v1307_v57 }
  0xde   : > { %v501_v25 = vpop.f32.mrf.mxu2 }
  0xdf   : > { %v519_v27 = vadd.f32 %v501_v25, %v371_v51  ;;  %v2459_v28 = vpop.f32.mrf.mxu3  ;;  %v1289_v51 = vadd.s32 %v1287_v49, %v1281_v42  ;;  %vm1319_vm10 = vc.u32 %v1317_v16, %v1313_v8 }
  0xe0   : > { %v361_v31 = vpop.f32.mrf.mxu1  ;;  %v1320_v30 = vsel %vm1319_vm10, 1, %v2172_v21 }
  0xe1   : > { %v619_v36 = vadd.f32 %v601_v58, %v519_v27  ;;  %v2468_v37 = vadd.f32 %v361_v31, %v2369_v23  ;;  %v2479_v46 = vpop.f32.mrf.mxu0  ;;  %v1265_v23 = vadd.s32 %v1264_v34, %v1254_v32  ;;  %v1293_v62 = vadd.s32 %v1291_v55, %v1289_v51 }
  0xe2   : > { %v1333_v31 = vand.u32 65535, %v2514_v9 }
  0xe3   : > { %v2477_v43 = vadd.f32 %v2417_v52, %v619_v36  ;;  %v1266_v59 = vadd.s32 %v1265_v23, %v1256_v22  ;;  %v1294_v13 = vadd.s32 %v1293_v62, %v1283_v60  ;;  %v1334_v36 = vshrl.u32 %v2514_v9, 16 }
  0xe4   : > { %v1337_v40 = vmul.u32 52428, %v1333_v31  ;;  %v1336_v41 = vmul.u32 52429, %v1333_v31 }
  0xe5   : > { %v1267_v10 = vshrl.u32 %v1266_v59, 3  ;;  %v1295_v27 = vadd.s32 %v1294_v13, %v1285_v12  ;;  %v1338_v22 = vmul.u32 52429, %v1334_v36  ;;  %v1339_v51 = vmul.u32 52428, %v1334_v36 }
  0xe6   : > { %v504_v20 = vpop.f32.mrf.mxu2  ;;  %v1340_v49 = vshll.u32 %v1337_v40, 16  ;;  %v1341_v57 = vshrl.u32 %v1337_v40, 16 }
  0xe7   : > { %v520_v52 = vadd.f32 %v504_v20, %v2423_v61  ;;  %v2492_v54 = vpop.f32.mrf.mxu3  ;;  %v1268_v34 = vmul.u32 10, %v1267_v10  ;;  %v1296_v23 = vshrl.u32 %v1295_v27, 3 }
  0xe8   : > { %v363_v58 = vpop.f32.mrf.mxu1  ;;  %vm1344_vm11 = vc.u32 %v1336_v41, %v1340_v49  ;;  %v1346_v60 = vadd.s32 %v1340_v49, %v1336_v41 }
  0xe9   : > { %v620_v2 = vadd.f32 %v2434_v4, %v520_v52  ;;  %v2503_v61 = vadd.f32 %v363_v58, %v2381_v44  ;;  %v2510_v18 = vpop.f32.mrf.mxu0  ;;  %v1316_v44 = vsel %vm1315_vm9, 1, %v2172_v21  ;;  %v2527_v47 = vsub.s32 %v2427_v63, %v1268_v34 }
  0xea   : > { %v1342_v52 = vshll.u32 %v1338_v22, 16  ;;  %v1345_v59 = vsel %vm1344_vm11, 1, %v2172_v21  ;;  %vm1760_vm11 = vcmask 1043457  }
  0xeb   : > { %v2508_v7 = vadd.f32 %v2425_v39, %v620_v2  ;;  %v1318_v39 = vadd.s32 %v1316_v44, %v1310_v19  ;;  %vm1533_vm12 = vcmp.ne.s32.totalorder %v2527_v47, 0  ;;  %vm1543_vm13 = vcmp.lt.s32.totalorder %v2527_v47, 0 }
  0xec   : > { %v1563_v3 = vadd.s32 10, %v2527_v47  ;;  %v1347_v5 = vadd.s32 %v1345_v59, %v1339_v51  ;;  %vm1348_vm14 = vc.u32 %v1346_v60, %v1342_v52  ;;  %v1343_v19 = vshrl.u32 %v1338_v22, 16  ;;  %vm2555_vm15 = vmand %vm1543_vm13, %vm1533_vm12 }
  0xed   : > { %v1322_v35 = vadd.s32 %v1320_v30, %v1318_v39  ;;  %v1349_v6 = vsel %vm1348_vm14, 1, %v2172_v21  ;;  %v2589_v59 = vadd.s32 48, %v2427_v63  ;;  %vm1761_vm12 = vsmask.f32 7942 }
  0xee   : > { %v506_v4 = vpop.f32.mrf.mxu2  ;;  %v1351_v8 = vadd.s32 %v1349_v6, %v1347_v5 }
  0xef   : > { %v521_v15 = vadd.f32 %v506_v4, %v2437_v11  ;;  %v2517_v25 = vpop.f32.mrf.mxu3  ;;  %v1323_v11 = vadd.s32 %v1322_v35, %v1312_v29  ;;  %v1573_v35 = vsel %vm2555_vm15, %v1563_v3, %v2527_v47 }
  0xf0   : > { %v836_v26 = vpop.f32.mrf.mxu1  ;;  %v1352_v30 = vadd.s32 %v1351_v8, %v1341_v57  ;;  %vm2598_vm8 = vcmp.lt.s32.totalorder %v1573_v35, 8 }
  0xf1   : > { %v621_v32 = vadd.f32 %v2459_v28, %v521_v15  ;;  %v1324_v48 = vadd.s32 %v1323_v11, %v1314_v38  ;;  %v2530_v28 = vadd.s32 32, %v2427_v63  ;;  %v2535_v58 = vpop.f32.mrf.mxu0  ;;  %v861_v34 = vadd.f32 %v836_v26, %v2407_v33 }
  0xf2   : > { %v1353_v38 = vadd.s32 %v1352_v30, %v1343_v19 }
  0xf3   : > { %v2524_v42 = vadd.f32 %v2439_v14, %v621_v32  ;;  %v1297_v14 = vmul.u32 10, %v1296_v23  ;;  %v1362_v62 = vand.u32 65535, %v2530_v28  ;;  %v1363_v10 = vshrl.u32 %v2530_v28, 16 }
  0xf4   : > { %v1354_v33 = vshrl.u32 %v1353_v38, 3 }
  0xf5   : > { %v1365_v12 = vmul.u32 52429, %v1362_v62  ;;  %v1366_v13 = vmul.u32 52428, %v1362_v62  ;;  %v1367_v15 = vmul.u32 52429, %v1363_v10  ;;  %v1368_v39 = vmul.u32 52428, %v1363_v10 }
  0xf6   : > { %v509_v20 = vpop.f32.mrf.mxu2 }
  0xf7   : > { %v522_v55 = vadd.f32 %v509_v20, %v2468_v37  ;;  %v2533_v56 = vpop.f32.mrf.mxu3  ;;  %v1325_v37 = vshrl.u32 %v1324_v48, 3  ;;  %v1369_v27 = vshll.u32 %v1366_v13, 16  ;;  %v1371_v32 = vshll.u32 %v1367_v15, 16 }
  0xf8   : > { %v2540_v2 = vpop.f32.mrf.mxu1  ;;  %v1370_v26 = vshrl.u32 %v1366_v13, 16  ;;  %v1372_v20 = vshrl.u32 %v1367_v15, 16 }
  0xf9   : > { %v622_v1 = vadd.f32 %v2492_v54, %v522_v55  ;;  %v2548_v54 = vsub.s32 %v2447_v17, %v1297_v14  ;;  %v1326_v44 = vmul.u32 10, %v1325_v37  ;;  %v2560_v17 = vadd.s32 40, %v2427_v63  ;;  %v2575_v22 = vpop.f32.mrf.mxu0 }
  0xfa   : > { %vm1373_vm1 = vc.u32 %v1365_v12, %v1369_v27  ;;  %v862_v30 = vadd.f32 %v2540_v2, %v2413_v45 }
  0xfb   : > { %v2551_v16 = vadd.f32 %v2479_v46, %v622_v1  ;;  %v1375_v46 = vadd.s32 %v1369_v27, %v1365_v12  ;;  %v1374_v40 = vsel %vm1373_vm1, 1, %v2172_v21  ;;  %vm1534_vm2 = vcmp.ne.s32.totalorder %v2548_v54, 0 }
  0xfc   : > { %v1376_v41 = vadd.s32 %v1374_v40, %v1368_v39  ;;  %v1391_v23 = vand.u32 65535, %v2560_v17  ;;  %vm1544_vm4 = vcmp.lt.s32.totalorder %v2548_v54, 0  ;;  %v1420_v12 = vand.u32 65535, %v2589_v59 }
  0xfd   : > { %vm1377_vm3 = vc.u32 %v1375_v46, %v1371_v32  ;;  %vm2593_vm6 = vmand %vm1544_vm4, %vm1534_vm2  ;;  %v1421_v46 = vshrl.u32 %v2589_v59, 16  ;;  %vm1647_vm2 = vsmask.f32 1280 }
  0xfe   : > { %v511_v29 = vpop.f32.mrf.mxu2  ;;  %v1378_v48 = vsel %vm1377_vm3, 1, %v2172_v21  ;;  %v1395_v52 = vmul.u32 52428, %v1391_v23  ;;  %v1394_v55 = vmul.u32 52429, %v1391_v23  ;;  %vm1648_vm3 = vsmask.f32 5392 }
  0xff   : > { %v523_v31 = vadd.f32 %v511_v29, %v2503_v61  ;;  %v2567_v36 = vpop.f32.mrf.mxu3  ;;  %v2573_v61 = vsub.s32 %v2487_v50, %v1326_v44  ;;  %v1564_v50 = vadd.s32 10, %v2548_v54  ;;  %v1380_v51 = vadd.s32 %v1378_v48, %v1376_v41 }
 0x100   : > { %v841_v47 = vpop.f32.mrf.mxu1  ;;  %v1398_v37 = vshll.u32 %v1395_v52, 16  ;;  %v1399_v45 = vshrl.u32 %v1395_v52, 16  ;;  %v2642_v41 = vmul.u32 52429, %v1421_v46 }
 0x101   : > { %v623_v11 = vadd.f32 %v2517_v25, %v523_v31  ;;  %v1392_v25 = vshrl.u32 %v2560_v17, 16  ;;  %vm1535_vm5 = vcmp.ne.s32.totalorder %v2573_v61, 0  ;;  %vm1545_vm7 = vcmp.lt.s32.totalorder %v2573_v61, 0  ;;  %v2628_v32 = vpop.f32.mrf.mxu0 }
 0x102   : > { %v1381_v1 = vadd.s32 %v1380_v51, %v1370_v26  ;;  %v1565_v6 = vadd.s32 10, %v2573_v61  ;;  %v1574_v19 = vsel %vm2593_vm6, %v1564_v50, %v2548_v54  ;;  %vm2610_vm9 = vmand %vm1545_vm7, %vm1535_vm5  ;;  %vm1402_vm10 = vc.u32 %v1394_v55, %v1398_v37 }
 0x103   : > { %v2582_v49 = vadd.f32 %v2510_v18, %v623_v11  ;;  %v2586_v14 = vmul.u32 52429, %v1392_v25  ;;  %v1355_v18 = vmul.u32 10, %v1354_v33  ;;  %v1397_v57 = vmul.u32 52428, %v1392_v25  ;;  %vm2667_vm6 = vmand %vm1760_vm11, %vm1761_vm12 }
 0x104   : > { %v1382_v10 = vadd.s32 %v1381_v1, %v1372_v20  ;;  %v1404_v27 = vadd.s32 %v1398_v37, %v1394_v55  ;;  %vm2624_vm13 = vcmp.lt.s32.totalorder %v1574_v19, 8  ;;  %v2651_v51 = vadd.s32 56, %v2427_v63  ;;  %vm2707_vm11 = vmor %vm1647_vm2, %vm1648_vm3 }
 0x105   : > { %v1400_v4 = vshll.u32 %v2586_v14, 16  ;;  %v2618_v15 = vsub.s32 %v2514_v9, %v1355_v18  ;;  %v1575_v9 = vsel %vm2610_vm9, %v1565_v6, %v2573_v61  ;;  %v1401_v40 = vshrl.u32 %v2586_v14, 16 }
 0x106   : > { %v951_v60 = vpop.f32.mrf.mxu2  ;;  %v1383_v39 = vshrl.u32 %v1382_v10, 3  ;;  %v1426_v14 = vmul.u32 52428, %v1421_v46  ;;  %vm2659_vm4 = vcmp.lt.s32.totalorder %v1575_v9, 8 }
 0x107   : > { %v976_v3 = vadd.f32 %v951_v60, %v861_v34  ;;  %v2615_v44 = vpop.f32.mrf.mxu3  ;;  %v2634_v34 = vmul.u32 52428, %v1420_v12  ;;  %vm1406_vm14 = vc.u32 %v1404_v27, %v1400_v4  ;;  %vm1536_vm15 = vcmp.ne.s32.totalorder %v2618_v15, 0 }
 0x108   : > { %v2637_v38 = vpop.f32.mrf.mxu1  ;;  %v1407_v11 = vsel %vm1406_vm14, 1, %v2172_v21  ;;  %v1384_v26 = vmul.u32 10, %v1383_v39  ;;  %vm1546_vm1 = vcmp.lt.s32.totalorder %v2618_v15, 0  ;;  %v1566_v50 = vadd.s32 10, %v2618_v15 }
 0x109   : > { %v1090_v13 = vadd.f32 %v2533_v56, %v976_v3  ;;  %v1403_v56 = vsel %vm1402_vm10, 1, %v2172_v21  ;;  %v1427_v48 = vshll.u32 %v2634_v34, 16  ;;  %v1429_v60 = vshll.u32 %v2642_v41, 16  ;;  %vm2678_vm7 = vmand %vm1546_vm1, %vm1536_vm15 }
 0x10a   : > { %v1405_v29 = vadd.s32 %v1403_v56, %v1397_v57  ;;  %v2656_v18 = vsub.s32 %v2530_v28, %v1384_v26  ;;  %v1428_v1 = vshrl.u32 %v2634_v34, 16  ;;  %v1763_v28 = vld [vmem:[%s2444_s13 + $0x4] sm:$0xe]  ;;  %v1194_v56 = vpop.f32.mrf.mxu0  ;;  %v1449_v27 = vand.u32 65535, %v2651_v51 }
 0x10b   : > { %v1212_v54 = vadd.f32 %v2535_v58, %v1090_v13  ;;  %v863_v58 = vadd.f32 %v841_v47, %v2419_v53  ;;  %v1423_v47 = vmul.u32 52429, %v1420_v12  ;;  %v1430_v13 = vshrl.u32 %v2642_v41, 16 }
 0x10c   : > { %v1409_v53 = vadd.s32 %v1407_v11, %v1405_v29  ;;  %v1576_v31 = vsel %vm2678_vm7, %v1566_v50, %v2618_v15  ;;  %vm1537_vm9 = vcmp.ne.s32.totalorder %v2656_v18, 0  ;;  %vm1547_vm10 = vcmp.lt.s32.totalorder %v2656_v18, 0 }
 0x10d   : > { %v1222_v35 = vmax.f32 %v1212_v54, 0.0  ;;  %vm1431_vm5 = vc.u32 %v1423_v47, %v1427_v48  ;;  %v1433_v6 = vadd.s32 %v1427_v48, %v1423_v47  ;;  %v864_v26 = vadd.f32 %v2637_v38, %v2429_v0 }
 0x10e   : > { %v953_v2 = vpop.f32.mrf.mxu2  ;;  %v1410_v20 = vadd.s32 %v1409_v53, %v1399_v45  ;;  %v1432_v19 = vsel %vm1431_vm5, 1, %v2172_v21  ;;  %vm2713_vm12 = vcmp.lt.s32.totalorder %v1576_v31, 8 }
 0x10f   : > { %v1613_v61 = vsel %vm2598_vm8, %v1222_v35, 0.0  ;;  %v977_v33 = vadd.f32 %v953_v2, %v862_v30  ;;  %v2663_v5 = vpop.f32.mrf.mxu3  ;;  %v1434_v39 = vadd.s32 %v1432_v19, %v1426_v14  ;;  %vm1435_vm8 = vc.u32 %v1433_v6, %v1429_v60 }
 0x110   : > { %v1623_v23 = vpack.c.bf16 %v1613_v61, %v1613_v61  ;;  %v846_v30 = vpop.f32.mrf.mxu1  ;;  %v1436_v34 = vsel %vm1435_vm8, 1, %v2172_v21 }
 0x111   : > { %v1091_v25 = vadd.f32 %v2567_v36, %v977_v33  ;;  %v1411_v36 = vadd.s32 %v1410_v20, %v1401_v40  ;;  %v1438_v2 = vadd.s32 %v1436_v34, %v1434_v39  ;;  %v1450_v40 = vshrl.u32 %v2651_v51, 16 }
 0x112   : > { %v1651_v52 = vshrl.u32 %v1623_v23, 16  ;;  %v1654_v55 = vshll.u32 %v1623_v23, 16  ;;  %v2696_v33 = vmul.u32 52428, %v1449_v27  ;;  %v865_v14 = vadd.f32 %v846_v30, %v2451_v24 }
 0x113   : > { %v1213_v62 = vadd.f32 %v2575_v22, %v1091_v25  ;;  %v1412_v12 = vshrl.u32 %v1411_v36, 3  ;;  %v1439_v61 = vadd.s32 %v1438_v2, %v1428_v1  ;;  %v2711_v50 = vmul.u32 52429, %v1450_v40 }
 0x114   : > { %v1653_v37 = vrot.slane %v1651_v52, 6  ;;  %v1656_v3 = vrot.slane %v1654_v55, 7  ;;  %v1456_v38 = vshll.u32 %v2696_v33, 16 }
 0x115   : > { %v1223_v10 = vmax.f32 %v1213_v62, 0.0  ;;  %v1413_v46 = vmul.u32 10, %v1412_v12  ;;  %v1440_v25 = vadd.s32 %v1439_v61, %v1430_v13  ;;  %v1458_v6 = vshll.u32 %v2711_v50, 16 }
 0x116   : > { %v1657_v8 = vor.u32 %v1656_v3, %v1653_v37  ;;  %v956_v4 = vpop.f32.mrf.mxu2  ;;  %v1455_v3 = vmul.u32 52428, %v1450_v40 }
 0x117   : > { %v1614_v29 = vsel %vm2624_vm13, %v1223_v10, 0.0  ;;  %v978_v9 = vadd.f32 %v956_v4, %v863_v58  ;;  %v2703_v23 = vsub.s32 %v2560_v17, %v1413_v46  ;;  %vm2721_vm13 = vmand %vm1547_vm10, %vm1537_vm9  ;;  %v1075_v62 = vpop.f32.mrf.mxu3  ;;  %v1441_v36 = vshrl.u32 %v1440_v25, 3  ;;  %v1197_v10 = vpop.f32.mrf.mxu0 }
 0x118   : > { %v1764_v35 = vsel %vm2667_vm6, %v1657_v8, %v1763_v28  ;;  %v1624_v45 = vpack.c.bf16 %v1614_v29, %v1614_v29  ;;  %v1658_v52 = vrot.slane %v1657_v8, 4  ;;  %v848_v24 = vpop.f32.mrf.mxu1 }
 0x119   : > { %1765 = vst [vmem:[%s2444_s13 + $0x4] sm:$0xe] %v1764_v35  ;;  %v1092_v11 = vadd.f32 %v2615_v44, %v978_v9  ;;  %v1567_v44 = vadd.s32 10, %v2656_v18  ;;  %vm1538_vm14 = vcmp.ne.s32.totalorder %v2703_v23, 0  ;;  %vm1548_vm15 = vcmp.lt.s32.totalorder %v2703_v23, 0 }
 0x11a   : > { %v1660_v58 = vshrl.u32 %v1624_v45, 16  ;;  %v1663_v41 = vshll.u32 %v1624_v45, 16  ;;  %v1442_v4 = vmul.u32 10, %v1441_v36  ;;  %v2744_v9 = vadd.s32 10, %v2703_v23 }
 0x11b   : > { %v1214_v53 = vadd.f32 %v2628_v32, %v1092_v11  ;;  %v1452_v32 = vmul.u32 52429, %v1449_v27  ;;  %v1577_v12 = vsel %vm2721_vm13, %v1567_v44, %v2656_v18  ;;  %v2741_v18 = vadd.s32 64, %v2427_v63 }
 0x11c   : > { %v1662_v47 = vrot.slane %v1660_v58, 6  ;;  %v1665_v48 = vrot.slane %v1663_v41, 7  ;;  %v2758_v11 = vsub.s32 %v2589_v59, %v1442_v4  ;;  %vm2763_vm5 = vcmp.lt.s32.totalorder %v1577_v12, 8 }
 0x11d   : > { %v1224_v20 = vmax.f32 %v1214_v53, 0.0  ;;  %vm1460_vm1 = vc.u32 %v1452_v32, %v1456_v38  ;;  %v1462_v13 = vadd.s32 %v1456_v38, %v1452_v32  ;;  %v1478_v45 = vand.u32 65535, %v2741_v18 }
 0x11e   : > { %v1666_v55 = vor.u32 %v1665_v48, %v1662_v47  ;;  %v958_v60 = vpop.f32.mrf.mxu2  ;;  %v1461_v54 = vsel %vm1460_vm1, 1, %v2172_v21  ;;  %v1479_v58 = vshrl.u32 %v2741_v18, 16  ;;  %v866_v44 = vadd.f32 %v848_v24, %v2477_v43 }
 0x11f   : > { %v1615_v1 = vsel %vm2659_vm4, %v1224_v20, 0.0  ;;  %v979_v37 = vadd.f32 %v958_v60, %v864_v26  ;;  %v1463_v27 = vadd.s32 %v1461_v54, %v1455_v3  ;;  %vm1464_vm3 = vc.u32 %v1462_v13, %v1458_v6  ;;  %vm2751_vm4 = vmand %vm1548_vm15, %vm1538_vm14  ;;  %v1077_v47 = vpop.f32.mrf.mxu3 }
 0x120   : > { %v1667_v22 = vsel %vm2707_vm11, %v1658_v52, %v1666_v55  ;;  %v1625_v28 = vpack.c.bf16 %v1615_v1, %v1615_v1  ;;  %v1668_v46 = vrot.slane %v1666_v55, 4  ;;  %v1465_v35 = vsel %vm1464_vm3, 1, %v2172_v21  ;;  %v851_v55 = vpop.f32.mrf.mxu1 }
 0x121   : > { %1766 = vst [vmem:[%s2444_s13 + $0x8] sm:$0xf] %v1667_v22  ;;  %v1093_v57 = vadd.f32 %v2663_v5, %v979_v37  ;;  %v1457_v5 = vshrl.u32 %v2696_v33, 16  ;;  %v1467_v31 = vadd.s32 %v1465_v35, %v1463_v27  ;;  %v1459_v26 = vshrl.u32 %v2711_v50, 16  ;;  %v1199_v50 = vpop.f32.mrf.mxu0 }
 0x122   : > { %v1670_v19 = vshrl.u32 %v1625_v28, 16  ;;  %v1673_v8 = vshll.u32 %v1625_v28, 16  ;;  %v1578_v48 = vsel %vm2751_vm4, %v2744_v9, %v2703_v23  ;;  %v1481_v0 = vmul.u32 52429, %v1478_v45 }
 0x123   : > { %v1215_v39 = vadd.f32 %v1194_v56, %v1093_v57  ;;  %v1468_v20 = vadd.s32 %v1467_v31, %v1457_v5  ;;  %v1482_v17 = vmul.u32 52428, %v1478_v45  ;;  %vm1539_vm6 = vcmp.ne.s32.totalorder %v2758_v11, 0 }
 0x124   : > { %v1672_v29 = vrot.slane %v1670_v19, 6  ;;  %v1675_v30 = vrot.slane %v1673_v8, 7  ;;  %v1483_v52 = vmul.u32 52429, %v1479_v58  ;;  %v1484_v60 = vmul.u32 52428, %v1479_v58 }
 0x125   : > { %v1225_v34 = vmax.f32 %v1215_v39, 0.0  ;;  %v1485_v36 = vshll.u32 %v1482_v17, 16  ;;  %v2778_v23 = vadd.s32 72, %v2427_v63  ;;  %vm1549_vm7 = vcmp.lt.s32.totalorder %v2758_v11, 0 }
 0x126   : > { %v1676_v2 = vor.u32 %v1675_v30, %v1672_v29  ;;  %v961_v40 = vpop.f32.mrf.mxu2  ;;  %v1487_v3 = vshll.u32 %v1483_v52, 16  ;;  %v1486_v19 = vshrl.u32 %v1482_v17, 16  ;;  %v1488_v27 = vshrl.u32 %v1483_v52, 16 }
 0x127   : > { %v1616_v41 = vsel %vm2713_vm12, %v1225_v34, 0.0  ;;  %v980_v61 = vadd.f32 %v961_v40, %v865_v14  ;;  %v1469_v14 = vadd.s32 %v1468_v20, %v1459_v26  ;;  %vm1489_vm8 = vc.u32 %v1481_v0, %v1485_v36  ;;  %vm2802_vm12 = vmand %vm1549_vm7, %vm1539_vm6 }
 0x128   : > { %v1677_v53 = vsel %vm2707_vm11, %v1668_v46, %v1676_v2  ;;  %v1626_v59 = vpack.c.bf16 %v1616_v41, %v1616_v41  ;;  %v1491_v6 = vadd.s32 %v1485_v36, %v1481_v0  ;;  %v1678_v22 = vrot.slane %v1676_v2, 4  ;;  %v1080_v46 = vpop.f32.mrf.mxu3 }
 0x129   : > { %1767 = vst [vmem:[%s2444_s13 + $0xc] sm:$0xf] %v1677_v53  ;;  %v1094_v25 = vadd.f32 %v1075_v62, %v980_v61  ;;  %v1470_v24 = vshrl.u32 %v1469_v14, 3  ;;  %v1507_v54 = vand.u32 65535, %v2778_v23  ;;  %v1508_v30 = vshrl.u32 %v2778_v23, 16  ;;  %v1202_v41 = vpop.f32.mrf.mxu0  ;;  %v853_v53 = vpop.f32.mrf.mxu1 }
 0x12a   : > { %v1680_v32 = vshrl.u32 %v1626_v59, 16  ;;  %v1683_v38 = vshll.u32 %v1626_v59, 16  ;;  %vm1493_vm9 = vc.u32 %v1491_v6, %v1487_v3  ;;  %v867_v35 = vadd.f32 %v851_v55, %v2508_v7 }
 0x12b   : > { %v1216_v43 = vadd.f32 %v1197_v10, %v1094_v25  ;;  %v1490_v10 = vsel %vm1489_vm8, 1, %v2172_v21  ;;  %v1494_v29 = vsel %vm1493_vm9, 1, %v2172_v21  ;;  %v1471_v34 = vmul.u32 10, %v1470_v24 }
 0x12c   : > { %v1682_v1 = vrot.slane %v1680_v32, 6  ;;  %v1685_v37 = vrot.slane %v1683_v38, 7  ;;  %v1492_v8 = vadd.s32 %v1490_v10, %v1484_v60  ;;  %vm2791_vm10 = vcmp.lt.s32.totalorder %v1578_v48, 8 }
 0x12d   : > { %v1226_v62 = vmax.f32 %v1216_v43, 0.0  ;;  %v1569_v40 = vadd.s32 10, %v2758_v11  ;;  %v2796_v33 = vmul.u32 52428, %v1507_v54  ;;  %v1510_v59 = vmul.u32 52429, %v1507_v54 }
 0x12e   : > { %v1686_v28 = vor.u32 %v1685_v37, %v1682_v1  ;;  %v963_v12 = vpop.f32.mrf.mxu2  ;;  %v1496_v56 = vadd.s32 %v1494_v29, %v1492_v8  ;;  %v1472_v20 = vsub.s32 %v2651_v51, %v1471_v34  ;;  %v1513_v60 = vmul.u32 52428, %v1508_v30 }
 0x12f   : > { %v1617_v57 = vsel %vm2763_vm5, %v1226_v62, 0.0  ;;  %v981_v13 = vadd.f32 %v963_v12, %v866_v44  ;;  %v1514_v17 = vshll.u32 %v2796_v33, 16  ;;  %v1579_v55 = vsel %vm2802_vm12, %v1569_v40, %v2758_v11 }
 0x130   : > { %v1687_v63 = vsel %vm2707_vm11, %v1678_v22, %v1686_v28  ;;  %v1627_v4 = vpack.c.bf16 %v1617_v57, %v1617_v57  ;;  %v1497_v61 = vadd.s32 %v1496_v56, %v1486_v19  ;;  %v1688_v26 = vrot.slane %v1686_v28, 4  ;;  %v1082_v12 = vpop.f32.mrf.mxu3 }
 0x131   : > { %1768 = vst [vmem:[%s2444_s13 + $0x10] sm:$0xf] %v1687_v63  ;;  %v1095_v39 = vadd.f32 %v1077_v47, %v981_v13  ;;  %v2806_v47 = vmul.u32 52429, %v1508_v30  ;;  %vm1518_vm13 = vc.u32 %v1510_v59, %v1514_v17  ;;  %vm1540_vm14 = vcmp.ne.s32.totalorder %v1472_v20, 0  ;;  %v1204_v8 = vpop.f32.mrf.mxu0  ;;  %v856_v54 = vpop.f32.mrf.mxu1 }
 0x132   : > { %v1690_v9 = vshrl.u32 %v1627_v4, 16  ;;  %v1693_v5 = vshll.u32 %v1627_v4, 16  ;;  %v1498_v0 = vadd.s32 %v1497_v61, %v1488_v27  ;;  %v1519_v37 = vsel %vm1518_vm13, 1, %v2172_v21 }
 0x133   : > { %v1217_v45 = vadd.f32 %v1199_v50, %v1095_v39  ;;  %v1516_v51 = vshll.u32 %v2806_v47, 16  ;;  %vm1550_vm15 = vcmp.lt.s32.totalorder %v1472_v20, 0  ;;  %v1520_v6 = vadd.s32 %v1514_v17, %v1510_v59 }
 0x134   : > { %v1692_v31 = vrot.slane %v1690_v9, 6  ;;  %v1695_v58 = vrot.slane %v1693_v5, 7  ;;  %v1499_v43 = vshrl.u32 %v1498_v0, 3  ;;  %v868_v22 = vadd.f32 %v853_v53, %v2524_v42  ;;  %vm2823_vm4 = vmand %vm1550_vm15, %vm1540_vm14 }
 0x135   : > { %v1227_v44 = vmax.f32 %v1217_v45, 0.0  ;;  %vm1589_vm1 = vcmp.lt.s32.totalorder %v1579_v55, 8  ;;  %v1570_v10 = vadd.s32 10, %v1472_v20  ;;  %v1521_v57 = vadd.s32 %v1519_v37, %v1513_v60  ;;  %vm1776_vm15 = vmand %vm228_vm0, %vm1647_vm2 }
 0x136   : > { %v1696_v48 = vor.u32 %v1695_v58, %v1692_v31  ;;  %v966_v25 = vpop.f32.mrf.mxu2  ;;  %v1500_v62 = vmul.u32 10, %v1499_v43  ;;  %vm1522_vm3 = vc.u32 %v1520_v6, %v1516_v51  ;;  %v1515_v42 = vshrl.u32 %v2796_v33, 16 }
 0x137   : > { %v1618_v32 = vsel %vm2791_vm10, %v1227_v44, 0.0  ;;  %v982_v38 = vadd.f32 %v966_v25, %v867_v35  ;;  %v1523_v30 = vsel %vm1522_vm3, 1, %v2172_v21  ;;  %v1580_v34 = vsel %vm2823_vm4, %v1570_v10, %v1472_v20 }
 0x138   : > { %v1697_v50 = vsel %vm2707_vm11, %v1688_v26, %v1696_v48  ;;  %v1628_v52 = vpack.c.bf16 %v1618_v32, %v1618_v32  ;;  %v1698_v13 = vrot.slane %v1696_v48, 4  ;;  %v1501_v29 = vsub.s32 %v2741_v18, %v1500_v62  ;;  %v1085_v44 = vpop.f32.mrf.mxu3 }
 0x139   : > { %1769 = vst [vmem:[%s2444_s13 + $0x14] sm:$0xf] %v1697_v50  ;;  %v1096_v14 = vadd.f32 %v1080_v46, %v982_v38  ;;  %v1517_v56 = vshrl.u32 %v2806_v47, 16  ;;  %v1525_v35 = vadd.s32 %v1523_v30, %v1521_v57  ;;  %vm1590_vm7 = vcmp.lt.s32.totalorder %v1580_v34, 8  ;;  %v1207_v17 = vpop.f32.mrf.mxu0 }
 0x13a   : > { %v1700_v36 = vshrl.u32 %v1628_v52, 16  ;;  %v1703_v1 = vshll.u32 %v1628_v52, 16  ;;  %vm1541_vm5 = vcmp.ne.s32.totalorder %v1501_v29, 0  ;;  %vm1551_vm6 = vcmp.lt.s32.totalorder %v1501_v29, 0 }
 0x13b   : > { %v1218_v3 = vadd.f32 %v1202_v41, %v1096_v14  ;;  %v1526_v18 = vadd.s32 %v1525_v35, %v1515_v42  ;;  %v869_v58 = vadd.f32 %v856_v54, %v2551_v16  ;;  %v1571_v61 = vadd.s32 10, %v1501_v29  ;;  %vm2837_vm8 = vmand %vm1551_vm6, %vm1541_vm5  ;;  %v858_v16 = vpop.f32.mrf.mxu1  ;;  %v1777_v35 = vld [vmem:[%s2444_s13 + $0x2c] sm:$0x3] }
 0x13c   : > { %v1702_v28 = vrot.slane %v1700_v36, 6  ;;  %v1705_v11 = vrot.slane %v1703_v1, 7  ;;  %v870_v60 = vadd.f32 %v858_v16, %v2582_v49 }
 0x13d   : > { %v1228_v24 = vmax.f32 %v1218_v3, 0.0  ;;  %v1527_v33 = vadd.s32 %v1526_v18, %v1517_v56  ;;  %v1581_v38 = vsel %vm2837_vm8, %v1571_v61, %v1501_v29 }
 0x13e   : > { %v1706_v19 = vor.u32 %v1705_v11, %v1702_v28  ;;  %v968_v63 = vpop.f32.mrf.mxu2  ;;  %vm1591_vm9 = vcmp.lt.s32.totalorder %v1581_v38, 8 }
 0x13f   : > { %v1619_v39 = vsel %vm1589_vm1, %v1228_v24, 0.0  ;;  %v983_v27 = vadd.f32 %v968_v63, %v868_v22  ;;  %v1528_v25 = vshrl.u32 %v1527_v33, 3 }
 0x140   : > { %v1707_v9 = vsel %vm2707_vm11, %v1698_v13, %v1706_v19  ;;  %v1629_v5 = vpack.c.bf16 %v1619_v39, %v1619_v39  ;;  %v1708_v26 = vrot.slane %v1706_v19, 4 }
 0x141   : > { %1770 = vst [vmem:[%s2444_s13 + $0x18] sm:$0xf] %v1707_v9  ;;  %v1097_v46 = vadd.f32 %v1082_v12, %v983_v27  ;;  %v1529_v50 = vmul.u32 10, %v1528_v25  ;;  %v1087_v12 = vpop.f32.mrf.mxu3  ;;  %v1209_v13 = vpop.f32.mrf.mxu0 }
 0x142   : > { %v1710_v45 = vshrl.u32 %v1629_v5, 16  ;;  %v1713_v2 = vshll.u32 %v1629_v5, 16 }
 0x143   : > { %v1219_v40 = vadd.f32 %v1204_v8, %v1097_v46  ;;  %v1530_v14 = vsub.s32 %v2778_v23, %v1529_v50 }
 0x144   : > { %v1712_v31 = vrot.slane %v1710_v45, 6  ;;  %v1715_v21 = vrot.slane %v1713_v2, 7 }
 0x145   : > { %v1229_v41 = vmax.f32 %v1219_v40, 0.0  ;;  %vm1542_vm10 = vcmp.ne.s32.totalorder %v1530_v14, 0  ;;  %vm1552_vm12 = vcmp.lt.s32.totalorder %v1530_v14, 0  ;;  %v1572_v37 = vadd.s32 10, %v1530_v14 }
 0x146   : > { %v1716_v53 = vor.u32 %v1715_v21, %v1712_v31  ;;  %v971_v7 = vpop.f32.mrf.mxu2  ;;  %vm1562_vm13 = vmand %vm1552_vm12, %vm1542_vm10 }
 0x147   : > { %v1620_v47 = vsel %vm1590_vm7, %v1229_v41, 0.0  ;;  %v984_v48 = vadd.f32 %v971_v7, %v869_v58  ;;  %v1582_v24 = vsel %vm1562_vm13, %v1572_v37, %v1530_v14 }
 0x148   : > { %v1717_v20 = vsel %vm2707_vm11, %v1708_v26, %v1716_v53  ;;  %v1630_v0 = vpack.c.bf16 %v1620_v47, %v1620_v47  ;;  %v1718_v3 = vrot.slane %v1716_v53, 4  ;;  %vm1592_vm14 = vcmp.lt.s32.totalorder %v1582_v24, 8 }
 0x149   : > { %1771 = vst [vmem:[%s2444_s13 + $0x1c] sm:$0xf] %v1717_v20  ;;  %v1098_v32 = vadd.f32 %v1085_v44, %v984_v48 }
 0x14a   : > { %v1720_v52 = vshrl.u32 %v1630_v0, 16  ;;  %v1723_v55 = vshll.u32 %v1630_v0, 16 }
 0x14b   : > { %v1220_v43 = vadd.f32 %v1207_v17, %v1098_v32 }
 0x14c   : > { %v1722_v51 = vrot.slane %v1720_v52, 6  ;;  %v1725_v36 = vrot.slane %v1723_v55, 7 }
 0x14d   : > { %v1230_v1 = vmax.f32 %v1220_v43, 0.0 }
 0x14e   : > { %v1726_v62 = vor.u32 %v1725_v36, %v1722_v51  ;;  %v973_v6 = vpop.f32.mrf.mxu2 }
 0x14f   : > { %v1621_v22 = vsel %vm1591_vm9, %v1230_v1, 0.0  ;;  %v985_v28 = vadd.f32 %v973_v6, %v870_v60 }
 0x150   : > { %v1727_v11 = vsel %vm2707_vm11, %v1718_v3, %v1726_v62  ;;  %v1631_v23 = vpack.c.bf16 %v1621_v22, %v1621_v22  ;;  %v1728_v42 = vrot.slane %v1726_v62, 4 }
 0x151   : > { %1772 = vst [vmem:[%s2444_s13 + $0x20] sm:$0xf] %v1727_v11  ;;  %v1099_v49 = vadd.f32 %v1087_v12, %v985_v28 }
 0x152   : > { %v1730_v10 = vshrl.u32 %v1631_v23, 16  ;;  %v1733_v57 = vshll.u32 %v1631_v23, 16 }
 0x153   : > { %v1221_v19 = vadd.f32 %v1209_v13, %v1099_v49 }
 0x154   : > { %v1732_v8 = vrot.slane %v1730_v10, 6  ;;  %v1735_v63 = vrot.slane %v1733_v57, 7 }
 0x155   : > { %v1231_v4 = vmax.f32 %v1221_v19, 0.0 }
 0x156   : > { %v1736_v54 = vor.u32 %v1735_v63, %v1732_v8 }
 0x157   : > { %v1622_v39 = vsel %vm1592_vm14, %v1231_v4, 0.0 }
 0x158   : > { %v1737_v27 = vsel %vm2707_vm11, %v1728_v42, %v1736_v54  ;;  %v1632_v29 = vpack.c.bf16 %v1622_v39, %v1622_v39  ;;  %v1738_v34 = vrot.slane %v1736_v54, 4 }
 0x159   : > { %1773 = vst [vmem:[%s2444_s13 + $0x24] sm:$0xf] %v1737_v27 }
 0x15a   : > { %v1740_v30 = vshrl.u32 %v1632_v29, 16  ;;  %v1743_v9 = vshll.u32 %v1632_v29, 16 }
 0x15c   : > { %v1742_v5 = vrot.slane %v1740_v30, 6  ;;  %v1745_v46 = vrot.slane %v1743_v9, 7 }
 0x15e   : > { %v1746_v56 = vor.u32 %v1745_v46, %v1742_v5 }
 0x160   : > { %v1747_v45 = vsel %vm2707_vm11, %v1738_v34, %v1746_v56  ;;  %v1748_v2 = vrot.slane %v1746_v56, 4 }
 0x161   : > { %1774 = vst [vmem:[%s2444_s13 + $0x28] sm:$0xf] %v1747_v45 }
 0x162   : > { %v1778_v40 = vsel %vm1776_vm15, %v1748_v2, %v1777_v35 }
 0x163   : > { %1779 = vst [vmem:[%s2444_s13 + $0x2c] sm:$0x3] %v1778_v40 }
 0x164 PF: > { %s13_s12 = sadd.s32 1, %s2170_s12  }
 0x165   : > { %p10_p4 = scmp.ge.s32.totalorder %s13_s12, 4  }
 0x167   :  { %12 = sbr.rel (!%p10_p4) target bundleno = 1 (0x1), region = 73 }

</bundles_post_ra>
